<compile_context>
chip_gen: v5e
topology: v5e:2x2
jax: 0.10.0
libtpu: 0.0.40
codegen_flags: <defaults>
</compile_context>

<pallas_src>
import functools
from typing import Dict

import jax
import jax.numpy as jnp
from jax.experimental import pallas as pl
from jax.experimental.pallas import tpu as pltpu

HIDDEN = 32          # logical hidden dim of the module
HP = 128             # lane-padded hidden width used inside the kernel
NUM_LAYERS = 2
EPS = 1e-5
NEG_SLOPE = 0.01


# ----------------------------- static helpers -----------------------------

def group_rels_by_dst(edge_types):
    by_dst = {}
    for et in edge_types:
        by_dst.setdefault(et[2], []).append(tuple(et))
    return {k: tuple(v) for k, v in by_dst.items()}


def pad_cols(a, width=HP):
    return jnp.pad(a, ((0, 0), (0, width - a.shape[1])))


def pad_vec(v, width=HP):
    return jnp.pad(v, (0, width - v.shape[0])).reshape(1, width)


def pad_w(w, pad_in=False):
    fi, fo = w.shape
    return jnp.pad(w, ((0, (HP - fi) if pad_in else 0), (0, HP - fo)))


def dense_mean_adj(edge_index, n_src, n_dst):
    """Normalized adjacency A[dst, src] = 1/deg(dst): A @ X_src == mean aggregation."""
    src, dst = edge_index[0], edge_index[1]
    A = jnp.zeros((n_dst, n_src), jnp.float32).at[dst, src].add(1.0)
    deg = jnp.sum(A, axis=1, keepdims=True)
    return A / jnp.maximum(deg, 1.0)


def build_adjacencies(edges, num_nodes, edge_types):
    """Per-dst-type column-concatenated normalized adjacency (built once)."""
    adj_cat = {}
    for dst, rels in group_rels_by_dst(edge_types).items():
        mats = [dense_mean_adj(edges[et], num_nodes[et[0]], num_nodes[dst])
                for et in rels]
        adj_cat[dst] = mats[0] if len(mats) == 1 else jnp.concatenate(mats, axis=1)
    return adj_cat


# ------------------------------ fused kernel ------------------------------

def _fused_forward_kernel(*refs, layout, node_types, lin_types, has_social,
                          rels_by_dst, num_layers, out_types):
    n_out = len(out_types)
    in_refs = refs[:len(refs) - n_out]
    out_refs = refs[len(refs) - n_out:]

    def get(name):
        return in_refs[layout[name]][...]

    def bn(h, g, be):
        # Training-mode BatchNorm1d (biased variance); var = E[h^2] - E[h]^2
        # halves the cross-sublane reductions vs mean((h-mu)^2).
        mean = jnp.mean(h, axis=0, keepdims=True)
        var = jnp.mean(h * h, axis=0, keepdims=True) - mean * mean
        return (h - mean) * jax.lax.rsqrt(var + EPS) * g + be

    def mm_bf16(a, b_bf16):
        # HP x HP matmuls: bf16 operands, f32 accumulation.
        return jnp.dot(a.astype(jnp.bfloat16), b_bf16,
                       preferred_element_type=jnp.float32)

    # ---- initial per-node-type projection + BN (activations stay in VMEM) ----
    x = {}
    for nt in node_types:
        if nt in lin_types:
            h = (jnp.dot(get(f'x_{nt}'), get(f'w_{nt}'),
                         preferred_element_type=jnp.float32) + get(f'b_{nt}'))
        else:
            h = get(f'x_{nt}')                      # already [N, HP], padded cols = 0
        x[nt] = bn(h, get(f'g0_{nt}'), get(f'be0_{nt}'))
    if has_social:
        h = (jnp.dot(get('x_social'), get('w_social'),
                     preferred_element_type=jnp.float32) + get('b_social'))
        x['author_social'] = bn(h, get('g_social'), get('be_social'))

    # ---- hetero SAGE layers ----
    for i in range(num_layers):
        new_x = {}
        for nt, h_dst in x.items():
            rels = rels_by_dst.get(nt)
            if not rels:                            # no incoming relations -> pass through
                new_x[nt] = h_dst
                continue
            # shared lin_r term (weights pre-summed over relations) + summed lin_l bias
            acc = mm_bf16(h_dst, get(f'wr_{i}_{nt}')) + get(f'bsum_{i}_{nt}')
            # y_r = x_src_r @ wl_r, then ONE adjacency matmul over the
            # K-concatenated [adj_0 | adj_1 | ...] @ [y_0; y_1; ...]
            ys = [mm_bf16(x[src], get(f'wl_{i}_{nt}_{r}'))
                  for r, (src, _rel, _dst) in enumerate(rels)]
            y_cat = ys[0] if len(ys) == 1 else jnp.concatenate(ys, axis=0)
            acc = acc + jnp.dot(get(f'adj_{nt}'), y_cat,
                                preferred_element_type=jnp.float32)
            acc = acc * (1.0 / len(rels))           # HeteroConv aggr='mean'
            h = jnp.maximum(acc, NEG_SLOPE * acc)   # leaky_relu(0.01)
            # TODO(synk): dropout (p=0.1, training) treated as identity.
            new_x[nt] = bn(h, get(f'gc_{i}_{nt}'), get(f'bec_{i}_{nt}'))
        x = new_x

    for o_ref, nt in zip(out_refs, out_types):
        o_ref[...] = x[nt]


# ------------------------------ forward maker ------------------------------

def make_rgcn_forward(node_types, edge_types, in_dims: Dict[str, int],
                      has_social: bool, num_layers: int = NUM_LAYERS):
    node_types = tuple(node_types)
    rels_by_dst = group_rels_by_dst(edge_types)
    lin_types = tuple(nt for nt in node_types if in_dims[nt] != HIDDEN)
    out_types = node_types + (('author_social',) if has_social else ())

    def forward(params, x_in, x_social, adj_cat):
        operands, specs, layout = [], [], {}

        def add(name, arr):
            layout[name] = len(operands)
            operands.append(arr)
            specs.append(pl.BlockSpec(arr.shape, lambda i: (0, 0)))

        for nt in node_types:
            if nt in lin_types:
                add(f'x_{nt}', x_in[nt])
                w, b = params['lins'][nt]
                add(f'w_{nt}', w); add(f'b_{nt}', b)
            else:
                add(f'x_{nt}', pad_cols(x_in[nt]))
            g, be = params['norms_initial'][nt]
            add(f'g0_{nt}', g); add(f'be0_{nt}', be)
        if has_social:
            add('x_social', x_social)
            w, b = params['social_lin']
            add('w_social', w); add('b_social', b)
            g, be = params['norms_social']
            add('g_social', g); add('be_social', be)
        for dst in rels_by_dst:
            add(f'adj_{dst}', adj_cat[dst])
        for i in range(num_layers):
            for dst, rels in rels_by_dst.items():
                lp = params['convs'][i][dst]
                for r in range(len(rels)):
                    add(f'wl_{i}_{dst}_{r}', lp['wl'][r])
                add(f'wr_{i}_{dst}', lp['wr_sum'])
                add(f'bsum_{i}_{dst}', lp['b_sum'])
                g, be = params['norms_conv'][(i, dst)]
                add(f'gc_{i}_{dst}', g); add(f'bec_{i}_{dst}', be)

        n_rows = {nt: x_in[nt].shape[0] for nt in node_types}
        if has_social:
            n_rows['author_social'] = x_social.shape[0]
        out_shape = tuple(jax.ShapeDtypeStruct((n_rows[t], HP), jnp.float32)
                          for t in out_types)
        out_specs = tuple(pl.BlockSpec((n_rows[t], HP), lambda i: (0, 0))
                          for t in out_types)

        kern = functools.partial(
            _fused_forward_kernel, layout=layout, node_types=node_types,
            lin_types=lin_types, has_social=has_social,
            rels_by_dst=rels_by_dst, num_layers=num_layers,
            out_types=out_types)

        outs = pl.pallas_call(
            kern,
            out_shape=out_shape,
            grid=(1,),
            in_specs=specs,
            out_specs=out_specs,
            compiler_params=pltpu.CompilerParams(
                dimension_semantics=("arbitrary",)),
        )(*operands)
        # slice back from the lane-padded width to the logical hidden_dim
        return {t: o[:, :HIDDEN] for t, o in zip(out_types, outs)}

    return jax.jit(forward)


# -------------------------------- parameters --------------------------------

def init_params(key, in_dims: Dict[str, int], metadata):
    node_types, edge_types = metadata
    rels_by_dst = group_rels_by_dst(edge_types)
    params = {'lins': {}, 'norms_initial': {}, 'convs': [], 'norms_conv': {}}
    keys = iter(jax.random.split(key, 128))

    def lin_init(k, fan_in, fan_out):
        kw, kb = jax.random.split(k)
        w = jax.random.normal(kw, (fan_in, fan_out), jnp.float32) / jnp.sqrt(float(fan_in))
        b = jax.random.normal(kb, (fan_out,), jnp.float32) * 0.01
        return w, b

    def bn_init():
        # gamma=1 / beta=0 on the real 32 columns, 0 on padded lanes so the
        # padded columns stay exactly zero through every layer.
        g = jnp.concatenate([jnp.ones((HIDDEN,), jnp.float32),
                             jnp.zeros((HP - HIDDEN,), jnp.float32)])
        return g.reshape(1, HP), jnp.zeros((1, HP), jnp.float32)

    for ntype, d in in_dims.items():
        if d != HIDDEN:
            w, b = lin_init(next(keys), d, HIDDEN)
            params['lins'][ntype] = (pad_w(w), pad_vec(b))   # f32 (tiny K matmul)
        params['norms_initial'][ntype] = bn_init()

    w, b = lin_init(next(keys), 3, HIDDEN)
    params['social_lin'] = (pad_w(w), pad_vec(b))            # f32 (tiny K matmul)
    params['norms_social'] = bn_init()

    for i in range(NUM_LAYERS):
        layer = {}
        for dst, rels in rels_by_dst.items():
            wls = []
            wr_sum = jnp.zeros((HP, HP), jnp.float32)
            b_sum = jnp.zeros((1, HP), jnp.float32)
            for _ in rels:
                wl, bl = lin_init(next(keys), HIDDEN, HIDDEN)
                wr, _ = lin_init(next(keys), HIDDEN, HIDDEN)  # lin_r: no bias
                wls.append(pad_w(wl, pad_in=True).astype(jnp.bfloat16))
                wr_sum = wr_sum + pad_w(wr, pad_in=True)
                b_sum = b_sum + pad_vec(bl)
            # wr_sum / b_sum precomputed at init (review: don't re-derive per call)
            layer[dst] = {'wl': wls,
                          'wr_sum': wr_sum.astype(jnp.bfloat16),
                          'b_sum': b_sum}
        params['convs'].append(layer)
        for ntype in node_types:
            params['norms_conv'][(i, ntype)] = bn_init()
    return params


# ---------------------------------- main ----------------------------------

if __name__ == "__main__":
    key = jax.random.PRNGKey(0)
    k_feat_p, k_feat_a, k_soc, k_e1, k_e2, k_params = jax.random.split(key, 6)

    n_paper, n_author = 16, 8
    in_dims = {'paper': 16, 'author': HIDDEN}   # author already hidden-sized -> no lin
    node_types = ['paper', 'author']
    edge_types = [('author', 'writes', 'paper'),
                  ('paper', 'written_by', 'author'),
                  ('paper', 'cites', 'paper')]
    metadata = (node_types, edge_types)

    # deterministic synthetic hetero-graph
    writes_src = jax.random.randint(k_e1, (24,), 0, n_author, dtype=jnp.int32)
    writes_dst = jax.random.randint(jax.random.fold_in(k_e1, 1), (24,), 0, n_paper,
                                    dtype=jnp.int32)
    cites_src = jax.random.randint(k_e2, (20,), 0, n_paper, dtype=jnp.int32)
    cites_dst = jax.random.randint(jax.random.fold_in(k_e2, 1), (20,), 0, n_paper,
                                   dtype=jnp.int32)

    x_in = {
        'paper': jax.random.normal(k_feat_p, (n_paper, in_dims['paper']), jnp.float32),
        'author': jax.random.normal(k_feat_a, (n_author, in_dims['author']), jnp.float32),
    }
    x_social = jax.random.normal(k_soc, (n_author, 3), jnp.float32)
    edges = {
        ('author', 'writes', 'paper'): jnp.stack([writes_src, writes_dst]),
        ('paper', 'written_by', 'author'): jnp.stack([writes_dst, writes_src]),
        ('paper', 'cites', 'paper'): jnp.stack([cites_src, cites_dst]),
    }
    num_nodes = {'paper': n_paper, 'author': n_author}

    params = init_params(k_params, in_dims, metadata)
    # normalized adjacencies built ONCE, outside the (jitted) forward
    adj_cat = build_adjacencies(edges, num_nodes, edge_types)

    forward = make_rgcn_forward(node_types, edge_types, in_dims, has_social=True)
    x_dict = forward(params, x_in, x_social, adj_cat)

    for v in x_dict.values():
        jax.block_until_ready(v)

    assert x_dict['paper'].shape == (n_paper, HIDDEN)
    assert x_dict['author'].shape == (n_author, HIDDEN)
    assert x_dict['author_social'].shape == (n_author, HIDDEN)
    assert all(bool(jnp.all(jnp.isfinite(v))) for v in x_dict.values())
    print("KERNEL_OK")
</pallas_src>

<mosaic_0001>
module attributes {stable_mosaic.version = 11 : i64} {
  func.func @_fused_forward_kernel(%arg0: i32, %arg1: memref<16x16xf32, #tpu.memory_space<vmem>>, %arg2: memref<16x128xf32, #tpu.memory_space<vmem>>, %arg3: memref<1x128xf32, #tpu.memory_space<vmem>>, %arg4: memref<1x128xf32, #tpu.memory_space<vmem>>, %arg5: memref<1x128xf32, #tpu.memory_space<vmem>>, %arg6: memref<8x128xf32, #tpu.memory_space<vmem>>, %arg7: memref<1x128xf32, #tpu.memory_space<vmem>>, %arg8: memref<1x128xf32, #tpu.memory_space<vmem>>, %arg9: memref<8x3xf32, #tpu.memory_space<vmem>>, %arg10: memref<3x128xf32, #tpu.memory_space<vmem>>, %arg11: memref<1x128xf32, #tpu.memory_space<vmem>>, %arg12: memref<1x128xf32, #tpu.memory_space<vmem>>, %arg13: memref<1x128xf32, #tpu.memory_space<vmem>>, %arg14: memref<16x24xf32, #tpu.memory_space<vmem>>, %arg15: memref<8x16xf32, #tpu.memory_space<vmem>>, %arg16: memref<128x128xbf16, #tpu.memory_space<vmem>>, %arg17: memref<128x128xbf16, #tpu.memory_space<vmem>>, %arg18: memref<128x128xbf16, #tpu.memory_space<vmem>>, %arg19: memref<1x128xf32, #tpu.memory_space<vmem>>, %arg20: memref<1x128xf32, #tpu.memory_space<vmem>>, %arg21: memref<1x128xf32, #tpu.memory_space<vmem>>, %arg22: memref<128x128xbf16, #tpu.memory_space<vmem>>, %arg23: memref<128x128xbf16, #tpu.memory_space<vmem>>, %arg24: memref<1x128xf32, #tpu.memory_space<vmem>>, %arg25: memref<1x128xf32, #tpu.memory_space<vmem>>, %arg26: memref<1x128xf32, #tpu.memory_space<vmem>>, %arg27: memref<128x128xbf16, #tpu.memory_space<vmem>>, %arg28: memref<128x128xbf16, #tpu.memory_space<vmem>>, %arg29: memref<128x128xbf16, #tpu.memory_space<vmem>>, %arg30: memref<1x128xf32, #tpu.memory_space<vmem>>, %arg31: memref<1x128xf32, #tpu.memory_space<vmem>>, %arg32: memref<1x128xf32, #tpu.memory_space<vmem>>, %arg33: memref<128x128xbf16, #tpu.memory_space<vmem>>, %arg34: memref<128x128xbf16, #tpu.memory_space<vmem>>, %arg35: memref<1x128xf32, #tpu.memory_space<vmem>>, %arg36: memref<1x128xf32, #tpu.memory_space<vmem>>, %arg37: memref<1x128xf32, #tpu.memory_space<vmem>>, %arg38: memref<16x128xf32, #tpu.memory_space<vmem>>, %arg39: memref<8x128xf32, #tpu.memory_space<vmem>>, %arg40: memref<8x128xf32, #tpu.memory_space<vmem>>) attributes {dimension_semantics = [#tpu.dimension_semantics<arbitrary>], iteration_bounds = array<i64: 1>, scalar_prefetch = 0 : i64, scratch_operands = 0 : i64, tpu.core_type = #tpu.core_type<tc>, window_params = [{pipeline_mode = #tpu.pipeline_mode<synchronous>, transform_indices = @transform_0, window_bounds = array<i64: 16, 16>}, {pipeline_mode = #tpu.pipeline_mode<synchronous>, transform_indices = @transform_1, window_bounds = array<i64: 16, 128>}, {pipeline_mode = #tpu.pipeline_mode<synchronous>, transform_indices = @transform_2, window_bounds = array<i64: 1, 128>}, {pipeline_mode = #tpu.pipeline_mode<synchronous>, transform_indices = @transform_3, window_bounds = array<i64: 1, 128>}, {pipeline_mode = #tpu.pipeline_mode<synchronous>, transform_indices = @transform_4, window_bounds = array<i64: 1, 128>}, {pipeline_mode = #tpu.pipeline_mode<synchronous>, transform_indices = @transform_5, window_bounds = array<i64: 8, 128>}, {pipeline_mode = #tpu.pipeline_mode<synchronous>, transform_indices = @transform_6, window_bounds = array<i64: 1, 128>}, {pipeline_mode = #tpu.pipeline_mode<synchronous>, transform_indices = @transform_7, window_bounds = array<i64: 1, 128>}, {pipeline_mode = #tpu.pipeline_mode<synchronous>, transform_indices = @transform_8, window_bounds = array<i64: 8, 3>}, {pipeline_mode = #tpu.pipeline_mode<synchronous>, transform_indices = @transform_9, window_bounds = array<i64: 3, 128>}, {pipeline_mode = #tpu.pipeline_mode<synchronous>, transform_indices = @transform_10, window_bounds = array<i64: 1, 128>}, {pipeline_mode = #tpu.pipeline_mode<synchronous>, transform_indices = @transform_11, window_bounds = array<i64: 1, 128>}, {pipeline_mode = #tpu.pipeline_mode<synchronous>, transform_indices = @transform_12, window_bounds = array<i64: 1, 128>}, {pipeline_mode = #tpu.pipeline_mode<synchronous>, transform_indices = @transform_13, window_bounds = array<i64: 16, 24>}, {pipeline_mode = #tpu.pipeline_mode<synchronous>, transform_indices = @transform_14, window_bounds = array<i64: 8, 16>}, {pipeline_mode = #tpu.pipeline_mode<synchronous>, transform_indices = @transform_15, window_bounds = array<i64: 128, 128>}, {pipeline_mode = #tpu.pipeline_mode<synchronous>, transform_indices = @transform_16, window_bounds = array<i64: 128, 128>}, {pipeline_mode = #tpu.pipeline_mode<synchronous>, transform_indices = @transform_17, window_bounds = array<i64: 128, 128>}, {pipeline_mode = #tpu.pipeline_mode<synchronous>, transform_indices = @transform_18, window_bounds = array<i64: 1, 128>}, {pipeline_mode = #tpu.pipeline_mode<synchronous>, transform_indices = @transform_19, window_bounds = array<i64: 1, 128>}, {pipeline_mode = #tpu.pipeline_mode<synchronous>, transform_indices = @transform_20, window_bounds = array<i64: 1, 128>}, {pipeline_mode = #tpu.pipeline_mode<synchronous>, transform_indices = @transform_21, window_bounds = array<i64: 128, 128>}, {pipeline_mode = #tpu.pipeline_mode<synchronous>, transform_indices = @transform_22, window_bounds = array<i64: 128, 128>}, {pipeline_mode = #tpu.pipeline_mode<synchronous>, transform_indices = @transform_23, window_bounds = array<i64: 1, 128>}, {pipeline_mode = #tpu.pipeline_mode<synchronous>, transform_indices = @transform_24, window_bounds = array<i64: 1, 128>}, {pipeline_mode = #tpu.pipeline_mode<synchronous>, transform_indices = @transform_25, window_bounds = array<i64: 1, 128>}, {pipeline_mode = #tpu.pipeline_mode<synchronous>, transform_indices = @transform_26, window_bounds = array<i64: 128, 128>}, {pipeline_mode = #tpu.pipeline_mode<synchronous>, transform_indices = @transform_27, window_bounds = array<i64: 128, 128>}, {pipeline_mode = #tpu.pipeline_mode<synchronous>, transform_indices = @transform_28, window_bounds = array<i64: 128, 128>}, {pipeline_mode = #tpu.pipeline_mode<synchronous>, transform_indices = @transform_29, window_bounds = array<i64: 1, 128>}, {pipeline_mode = #tpu.pipeline_mode<synchronous>, transform_indices = @transform_30, window_bounds = array<i64: 1, 128>}, {pipeline_mode = #tpu.pipeline_mode<synchronous>, transform_indices = @transform_31, window_bounds = array<i64: 1, 128>}, {pipeline_mode = #tpu.pipeline_mode<synchronous>, transform_indices = @transform_32, window_bounds = array<i64: 128, 128>}, {pipeline_mode = #tpu.pipeline_mode<synchronous>, transform_indices = @transform_33, window_bounds = array<i64: 128, 128>}, {pipeline_mode = #tpu.pipeline_mode<synchronous>, transform_indices = @transform_34, window_bounds = array<i64: 1, 128>}, {pipeline_mode = #tpu.pipeline_mode<synchronous>, transform_indices = @transform_35, window_bounds = array<i64: 1, 128>}, {pipeline_mode = #tpu.pipeline_mode<synchronous>, transform_indices = @transform_36, window_bounds = array<i64: 1, 128>}, {pipeline_mode = #tpu.pipeline_mode<synchronous>, transform_indices = @transform_37, window_bounds = array<i64: 16, 128>}, {pipeline_mode = #tpu.pipeline_mode<synchronous>, transform_indices = @transform_38, window_bounds = array<i64: 8, 128>}, {pipeline_mode = #tpu.pipeline_mode<synchronous>, transform_indices = @transform_39, window_bounds = array<i64: 8, 128>}]} {
    %c0 = arith.constant 0 : index
    %c0_0 = arith.constant 0 : index
    %0 = vector.load %arg1[%c0, %c0_0] : memref<16x16xf32, #tpu.memory_space<vmem>>, vector<16x16xf32>
    %c0_1 = arith.constant 0 : index
    %c0_2 = arith.constant 0 : index
    %1 = vector.load %arg2[%c0_1, %c0_2] : memref<16x128xf32, #tpu.memory_space<vmem>>, vector<16x128xf32>
    %cst = arith.constant dense<0.000000e+00> : vector<16x128xf32>
    %2 = tpu.matmul %0, %1, %cst {dimension_numbers = #tpu.dot_dimension_numbers<[1], [0], [0], [1], [0, 0, 1, 1], [], []>} : vector<16x16xf32>, vector<16x128xf32>, vector<16x128xf32> -> vector<16x128xf32>
    %c0_3 = arith.constant 0 : index
    %c0_4 = arith.constant 0 : index
    %3 = vector.load %arg3[%c0_3, %c0_4] : memref<1x128xf32, #tpu.memory_space<vmem>>, vector<1x128xf32>
    %4 = vector.broadcast %3 : vector<1x128xf32> to vector<16x128xf32>
    %5 = arith.addf %2, %4 : vector<16x128xf32>
    %c0_5 = arith.constant 0 : index
    %c0_6 = arith.constant 0 : index
    %6 = vector.load %arg4[%c0_5, %c0_6] : memref<1x128xf32, #tpu.memory_space<vmem>>, vector<1x128xf32>
    %c0_7 = arith.constant 0 : index
    %c0_8 = arith.constant 0 : index
    %7 = vector.load %arg5[%c0_7, %c0_8] : memref<1x128xf32, #tpu.memory_space<vmem>>, vector<1x128xf32>
    %cst_9 = arith.constant dense<0.000000e+00> : vector<128xf32>
    %8 = vector.multi_reduction <add>, %5, %cst_9 [0] : vector<16x128xf32> to vector<128xf32>
    %9 = vector.shape_cast %8 : vector<128xf32> to vector<1x128xf32>
    %cst_10 = arith.constant 1.600000e+01 : f32
    %10 = vector.broadcast %cst_10 : f32 to vector<1x128xf32>
    %11 = arith.divf %9, %10 : vector<1x128xf32>
    %12 = arith.mulf %5, %5 : vector<16x128xf32>
    %cst_11 = arith.constant dense<0.000000e+00> : vector<128xf32>
    %13 = vector.multi_reduction <add>, %12, %cst_11 [0] : vector<16x128xf32> to vector<128xf32>
    %14 = vector.shape_cast %13 : vector<128xf32> to vector<1x128xf32>
    %cst_12 = arith.constant 1.600000e+01 : f32
    %15 = vector.broadcast %cst_12 : f32 to vector<1x128xf32>
    %16 = arith.divf %14, %15 : vector<1x128xf32>
    %17 = arith.mulf %11, %11 : vector<1x128xf32>
    %18 = arith.subf %16, %17 : vector<1x128xf32>
    %19 = vector.broadcast %11 : vector<1x128xf32> to vector<16x128xf32>
    %20 = arith.subf %5, %19 : vector<16x128xf32>
    %cst_13 = arith.constant 9.99999974E-6 : f32
    %21 = vector.broadcast %cst_13 : f32 to vector<1x128xf32>
    %22 = arith.addf %18, %21 : vector<1x128xf32>
    %23 = math.rsqrt %22 : vector<1x128xf32>
    %24 = vector.broadcast %23 : vector<1x128xf32> to vector<16x128xf32>
    %25 = arith.mulf %20, %24 : vector<16x128xf32>
    %26 = vector.broadcast %6 : vector<1x128xf32> to vector<16x128xf32>
    %27 = arith.mulf %25, %26 : vector<16x128xf32>
    %28 = vector.broadcast %7 : vector<1x128xf32> to vector<16x128xf32>
    %29 = arith.addf %27, %28 : vector<16x128xf32>
    %c0_14 = arith.constant 0 : index
    %c0_15 = arith.constant 0 : index
    %30 = vector.load %arg6[%c0_14, %c0_15] : memref<8x128xf32, #tpu.memory_space<vmem>>, vector<8x128xf32>
    %c0_16 = arith.constant 0 : index
    %c0_17 = arith.constant 0 : index
    %31 = vector.load %arg7[%c0_16, %c0_17] : memref<1x128xf32, #tpu.memory_space<vmem>>, vector<1x128xf32>
    %c0_18 = arith.constant 0 : index
    %c0_19 = arith.constant 0 : index
    %32 = vector.load %arg8[%c0_18, %c0_19] : memref<1x128xf32, #tpu.memory_space<vmem>>, vector<1x128xf32>
    %cst_20 = arith.constant dense<0.000000e+00> : vector<128xf32>
    %33 = vector.multi_reduction <add>, %30, %cst_20 [0] : vector<8x128xf32> to vector<128xf32>
    %34 = vector.shape_cast %33 : vector<128xf32> to vector<1x128xf32>
    %cst_21 = arith.constant 8.000000e+00 : f32
    %35 = vector.broadcast %cst_21 : f32 to vector<1x128xf32>
    %36 = arith.divf %34, %35 : vector<1x128xf32>
    %37 = arith.mulf %30, %30 : vector<8x128xf32>
    %cst_22 = arith.constant dense<0.000000e+00> : vector<128xf32>
    %38 = vector.multi_reduction <add>, %37, %cst_22 [0] : vector<8x128xf32> to vector<128xf32>
    %39 = vector.shape_cast %38 : vector<128xf32> to vector<1x128xf32>
    %cst_23 = arith.constant 8.000000e+00 : f32
    %40 = vector.broadcast %cst_23 : f32 to vector<1x128xf32>
    %41 = arith.divf %39, %40 : vector<1x128xf32>
    %42 = arith.mulf %36, %36 : vector<1x128xf32>
    %43 = arith.subf %41, %42 : vector<1x128xf32>
    %44 = vector.broadcast %36 : vector<1x128xf32> to vector<8x128xf32>
    %45 = arith.subf %30, %44 : vector<8x128xf32>
    %cst_24 = arith.constant 9.99999974E-6 : f32
    %46 = vector.broadcast %cst_24 : f32 to vector<1x128xf32>
    %47 = arith.addf %43, %46 : vector<1x128xf32>
    %48 = math.rsqrt %47 : vector<1x128xf32>
    %49 = vector.broadcast %48 : vector<1x128xf32> to vector<8x128xf32>
    %50 = arith.mulf %45, %49 : vector<8x128xf32>
    %51 = vector.broadcast %31 : vector<1x128xf32> to vector<8x128xf32>
    %52 = arith.mulf %50, %51 : vector<8x128xf32>
    %53 = vector.broadcast %32 : vector<1x128xf32> to vector<8x128xf32>
    %54 = arith.addf %52, %53 : vector<8x128xf32>
    %c0_25 = arith.constant 0 : index
    %c0_26 = arith.constant 0 : index
    %55 = vector.load %arg9[%c0_25, %c0_26] : memref<8x3xf32, #tpu.memory_space<vmem>>, vector<8x3xf32>
    %c0_27 = arith.constant 0 : index
    %c0_28 = arith.constant 0 : index
    %56 = vector.load %arg10[%c0_27, %c0_28] : memref<3x128xf32, #tpu.memory_space<vmem>>, vector<3x128xf32>
    %cst_29 = arith.constant dense<0.000000e+00> : vector<8x128xf32>
    %57 = tpu.matmul %55, %56, %cst_29 {dimension_numbers = #tpu.dot_dimension_numbers<[1], [0], [0], [1], [0, 0, 1, 1], [], []>} : vector<8x3xf32>, vector<3x128xf32>, vector<8x128xf32> -> vector<8x128xf32>
    %c0_30 = arith.constant 0 : index
    %c0_31 = arith.constant 0 : index
    %58 = vector.load %arg11[%c0_30, %c0_31] : memref<1x128xf32, #tpu.memory_space<vmem>>, vector<1x128xf32>
    %59 = vector.broadcast %58 : vector<1x128xf32> to vector<8x128xf32>
    %60 = arith.addf %57, %59 : vector<8x128xf32>
    %c0_32 = arith.constant 0 : index
    %c0_33 = arith.constant 0 : index
    %61 = vector.load %arg12[%c0_32, %c0_33] : memref<1x128xf32, #tpu.memory_space<vmem>>, vector<1x128xf32>
    %c0_34 = arith.constant 0 : index
    %c0_35 = arith.constant 0 : index
    %62 = vector.load %arg13[%c0_34, %c0_35] : memref<1x128xf32, #tpu.memory_space<vmem>>, vector<1x128xf32>
    %cst_36 = arith.constant dense<0.000000e+00> : vector<128xf32>
    %63 = vector.multi_reduction <add>, %60, %cst_36 [0] : vector<8x128xf32> to vector<128xf32>
    %64 = vector.shape_cast %63 : vector<128xf32> to vector<1x128xf32>
    %cst_37 = arith.constant 8.000000e+00 : f32
    %65 = vector.broadcast %cst_37 : f32 to vector<1x128xf32>
    %66 = arith.divf %64, %65 : vector<1x128xf32>
    %67 = arith.mulf %60, %60 : vector<8x128xf32>
    %cst_38 = arith.constant dense<0.000000e+00> : vector<128xf32>
    %68 = vector.multi_reduction <add>, %67, %cst_38 [0] : vector<8x128xf32> to vector<128xf32>
    %69 = vector.shape_cast %68 : vector<128xf32> to vector<1x128xf32>
    %cst_39 = arith.constant 8.000000e+00 : f32
    %70 = vector.broadcast %cst_39 : f32 to vector<1x128xf32>
    %71 = arith.divf %69, %70 : vector<1x128xf32>
    %72 = arith.mulf %66, %66 : vector<1x128xf32>
    %73 = arith.subf %71, %72 : vector<1x128xf32>
    %74 = vector.broadcast %66 : vector<1x128xf32> to vector<8x128xf32>
    %75 = arith.subf %60, %74 : vector<8x128xf32>
    %cst_40 = arith.constant 9.99999974E-6 : f32
    %76 = vector.broadcast %cst_40 : f32 to vector<1x128xf32>
    %77 = arith.addf %73, %76 : vector<1x128xf32>
    %78 = math.rsqrt %77 : vector<1x128xf32>
    %79 = vector.broadcast %78 : vector<1x128xf32> to vector<8x128xf32>
    %80 = arith.mulf %75, %79 : vector<8x128xf32>
    %81 = vector.broadcast %61 : vector<1x128xf32> to vector<8x128xf32>
    %82 = arith.mulf %80, %81 : vector<8x128xf32>
    %83 = vector.broadcast %62 : vector<1x128xf32> to vector<8x128xf32>
    %84 = arith.addf %82, %83 : vector<8x128xf32>
    %c0_41 = arith.constant 0 : index
    %c0_42 = arith.constant 0 : index
    %85 = vector.load %arg18[%c0_41, %c0_42] : memref<128x128xbf16, #tpu.memory_space<vmem>>, vector<128x128xbf16>
    %86 = arith.truncf %29 : vector<16x128xf32> to vector<16x128xbf16>
    %cst_43 = arith.constant dense<0.000000e+00> : vector<16x128xf32>
    %87 = tpu.matmul %86, %85, %cst_43 {dimension_numbers = #tpu.dot_dimension_numbers<[1], [0], [0], [1], [0, 0, 1, 1], [], []>} : vector<16x128xbf16>, vector<128x128xbf16>, vector<16x128xf32> -> vector<16x128xf32>
    %c0_44 = arith.constant 0 : index
    %c0_45 = arith.constant 0 : index
    %88 = vector.load %arg19[%c0_44, %c0_45] : memref<1x128xf32, #tpu.memory_space<vmem>>, vector<1x128xf32>
    %89 = vector.broadcast %88 : vector<1x128xf32> to vector<16x128xf32>
    %90 = arith.addf %87, %89 : vector<16x128xf32>
    %c0_46 = arith.constant 0 : index
    %c0_47 = arith.constant 0 : index
    %91 = vector.load %arg16[%c0_46, %c0_47] : memref<128x128xbf16, #tpu.memory_space<vmem>>, vector<128x128xbf16>
    %92 = arith.truncf %54 : vector<8x128xf32> to vector<8x128xbf16>
    %cst_48 = arith.constant dense<0.000000e+00> : vector<8x128xf32>
    %93 = tpu.matmul %92, %91, %cst_48 {dimension_numbers = #tpu.dot_dimension_numbers<[1], [0], [0], [1], [0, 0, 1, 1], [], []>} : vector<8x128xbf16>, vector<128x128xbf16>, vector<8x128xf32> -> vector<8x128xf32>
    %c0_49 = arith.constant 0 : index
    %c0_50 = arith.constant 0 : index
    %94 = vector.load %arg17[%c0_49, %c0_50] : memref<128x128xbf16, #tpu.memory_space<vmem>>, vector<128x128xbf16>
    %95 = arith.truncf %29 : vector<16x128xf32> to vector<16x128xbf16>
    %cst_51 = arith.constant dense<0.000000e+00> : vector<16x128xf32>
    %96 = tpu.matmul %95, %94, %cst_51 {dimension_numbers = #tpu.dot_dimension_numbers<[1], [0], [0], [1], [0, 0, 1, 1], [], []>} : vector<16x128xbf16>, vector<128x128xbf16>, vector<16x128xf32> -> vector<16x128xf32>
    %97 = tpu.concatenate %93, %96 in 0 : vector<8x128xf32>, vector<16x128xf32> -> vector<24x128xf32>
    %c0_52 = arith.constant 0 : index
    %c0_53 = arith.constant 0 : index
    %98 = vector.load %arg14[%c0_52, %c0_53] : memref<16x24xf32, #tpu.memory_space<vmem>>, vector<16x24xf32>
    %cst_54 = arith.constant dense<0.000000e+00> : vector<16x128xf32>
    %99 = tpu.matmul %98, %97, %cst_54 {dimension_numbers = #tpu.dot_dimension_numbers<[1], [0], [0], [1], [0, 0, 1, 1], [], []>} : vector<16x24xf32>, vector<24x128xf32>, vector<16x128xf32> -> vector<16x128xf32>
    %100 = arith.addf %90, %99 : vector<16x128xf32>
    %cst_55 = arith.constant 5.000000e-01 : f32
    %101 = vector.broadcast %cst_55 : f32 to vector<16x128xf32>
    %102 = arith.mulf %100, %101 : vector<16x128xf32>
    %cst_56 = arith.constant 0.00999999977 : f32
    %103 = vector.broadcast %cst_56 : f32 to vector<16x128xf32>
    %104 = arith.mulf %103, %102 : vector<16x128xf32>
    %105 = arith.maximumf %102, %104 : vector<16x128xf32>
    %c0_57 = arith.constant 0 : index
    %c0_58 = arith.constant 0 : index
    %106 = vector.load %arg20[%c0_57, %c0_58] : memref<1x128xf32, #tpu.memory_space<vmem>>, vector<1x128xf32>
    %c0_59 = arith.constant 0 : index
    %c0_60 = arith.constant 0 : index
    %107 = vector.load %arg21[%c0_59, %c0_60] : memref<1x128xf32, #tpu.memory_space<vmem>>, vector<1x128xf32>
    %cst_61 = arith.constant dense<0.000000e+00> : vector<128xf32>
    %108 = vector.multi_reduction <add>, %105, %cst_61 [0] : vector<16x128xf32> to vector<128xf32>
    %109 = vector.shape_cast %108 : vector<128xf32> to vector<1x128xf32>
    %cst_62 = arith.constant 1.600000e+01 : f32
    %110 = vector.broadcast %cst_62 : f32 to vector<1x128xf32>
    %111 = arith.divf %109, %110 : vector<1x128xf32>
    %112 = arith.mulf %105, %105 : vector<16x128xf32>
    %cst_63 = arith.constant dense<0.000000e+00> : vector<128xf32>
    %113 = vector.multi_reduction <add>, %112, %cst_63 [0] : vector<16x128xf32> to vector<128xf32>
    %114 = vector.shape_cast %113 : vector<128xf32> to vector<1x128xf32>
    %cst_64 = arith.constant 1.600000e+01 : f32
    %115 = vector.broadcast %cst_64 : f32 to vector<1x128xf32>
    %116 = arith.divf %114, %115 : vector<1x128xf32>
    %117 = arith.mulf %111, %111 : vector<1x128xf32>
    %118 = arith.subf %116, %117 : vector<1x128xf32>
    %119 = vector.broadcast %111 : vector<1x128xf32> to vector<16x128xf32>
    %120 = arith.subf %105, %119 : vector<16x128xf32>
    %cst_65 = arith.constant 9.99999974E-6 : f32
    %121 = vector.broadcast %cst_65 : f32 to vector<1x128xf32>
    %122 = arith.addf %118, %121 : vector<1x128xf32>
    %123 = math.rsqrt %122 : vector<1x128xf32>
    %124 = vector.broadcast %123 : vector<1x128xf32> to vector<16x128xf32>
    %125 = arith.mulf %120, %124 : vector<16x128xf32>
    %126 = vector.broadcast %106 : vector<1x128xf32> to vector<16x128xf32>
    %127 = arith.mulf %125, %126 : vector<16x128xf32>
    %128 = vector.broadcast %107 : vector<1x128xf32> to vector<16x128xf32>
    %129 = arith.addf %127, %128 : vector<16x128xf32>
    %c0_66 = arith.constant 0 : index
    %c0_67 = arith.constant 0 : index
    %130 = vector.load %arg23[%c0_66, %c0_67] : memref<128x128xbf16, #tpu.memory_space<vmem>>, vector<128x128xbf16>
    %131 = arith.truncf %54 : vector<8x128xf32> to vector<8x128xbf16>
    %cst_68 = arith.constant dense<0.000000e+00> : vector<8x128xf32>
    %132 = tpu.matmul %131, %130, %cst_68 {dimension_numbers = #tpu.dot_dimension_numbers<[1], [0], [0], [1], [0, 0, 1, 1], [], []>} : vector<8x128xbf16>, vector<128x128xbf16>, vector<8x128xf32> -> vector<8x128xf32>
    %c0_69 = arith.constant 0 : index
    %c0_70 = arith.constant 0 : index
    %133 = vector.load %arg24[%c0_69, %c0_70] : memref<1x128xf32, #tpu.memory_space<vmem>>, vector<1x128xf32>
    %134 = vector.broadcast %133 : vector<1x128xf32> to vector<8x128xf32>
    %135 = arith.addf %132, %134 : vector<8x128xf32>
    %c0_71 = arith.constant 0 : index
    %c0_72 = arith.constant 0 : index
    %136 = vector.load %arg22[%c0_71, %c0_72] : memref<128x128xbf16, #tpu.memory_space<vmem>>, vector<128x128xbf16>
    %137 = arith.truncf %29 : vector<16x128xf32> to vector<16x128xbf16>
    %cst_73 = arith.constant dense<0.000000e+00> : vector<16x128xf32>
    %138 = tpu.matmul %137, %136, %cst_73 {dimension_numbers = #tpu.dot_dimension_numbers<[1], [0], [0], [1], [0, 0, 1, 1], [], []>} : vector<16x128xbf16>, vector<128x128xbf16>, vector<16x128xf32> -> vector<16x128xf32>
    %c0_74 = arith.constant 0 : index
    %c0_75 = arith.constant 0 : index
    %139 = vector.load %arg15[%c0_74, %c0_75] : memref<8x16xf32, #tpu.memory_space<vmem>>, vector<8x16xf32>
    %cst_76 = arith.constant dense<0.000000e+00> : vector<8x128xf32>
    %140 = tpu.matmul %139, %138, %cst_76 {dimension_numbers = #tpu.dot_dimension_numbers<[1], [0], [0], [1], [0, 0, 1, 1], [], []>} : vector<8x16xf32>, vector<16x128xf32>, vector<8x128xf32> -> vector<8x128xf32>
    %141 = arith.addf %135, %140 : vector<8x128xf32>
    %cst_77 = arith.constant 1.000000e+00 : f32
    %142 = vector.broadcast %cst_77 : f32 to vector<8x128xf32>
    %143 = arith.mulf %141, %142 : vector<8x128xf32>
    %cst_78 = arith.constant 0.00999999977 : f32
    %144 = vector.broadcast %cst_78 : f32 to vector<8x128xf32>
    %145 = arith.mulf %144, %143 : vector<8x128xf32>
    %146 = arith.maximumf %143, %145 : vector<8x128xf32>
    %c0_79 = arith.constant 0 : index
    %c0_80 = arith.constant 0 : index
    %147 = vector.load %arg25[%c0_79, %c0_80] : memref<1x128xf32, #tpu.memory_space<vmem>>, vector<1x128xf32>
    %c0_81 = arith.constant 0 : index
    %c0_82 = arith.constant 0 : index
    %148 = vector.load %arg26[%c0_81, %c0_82] : memref<1x128xf32, #tpu.memory_space<vmem>>, vector<1x128xf32>
    %cst_83 = arith.constant dense<0.000000e+00> : vector<128xf32>
    %149 = vector.multi_reduction <add>, %146, %cst_83 [0] : vector<8x128xf32> to vector<128xf32>
    %150 = vector.shape_cast %149 : vector<128xf32> to vector<1x128xf32>
    %cst_84 = arith.constant 8.000000e+00 : f32
    %151 = vector.broadcast %cst_84 : f32 to vector<1x128xf32>
    %152 = arith.divf %150, %151 : vector<1x128xf32>
    %153 = arith.mulf %146, %146 : vector<8x128xf32>
    %cst_85 = arith.constant dense<0.000000e+00> : vector<128xf32>
    %154 = vector.multi_reduction <add>, %153, %cst_85 [0] : vector<8x128xf32> to vector<128xf32>
    %155 = vector.shape_cast %154 : vector<128xf32> to vector<1x128xf32>
    %cst_86 = arith.constant 8.000000e+00 : f32
    %156 = vector.broadcast %cst_86 : f32 to vector<1x128xf32>
    %157 = arith.divf %155, %156 : vector<1x128xf32>
    %158 = arith.mulf %152, %152 : vector<1x128xf32>
    %159 = arith.subf %157, %158 : vector<1x128xf32>
    %160 = vector.broadcast %152 : vector<1x128xf32> to vector<8x128xf32>
    %161 = arith.subf %146, %160 : vector<8x128xf32>
    %cst_87 = arith.constant 9.99999974E-6 : f32
    %162 = vector.broadcast %cst_87 : f32 to vector<1x128xf32>
    %163 = arith.addf %159, %162 : vector<1x128xf32>
    %164 = math.rsqrt %163 : vector<1x128xf32>
    %165 = vector.broadcast %164 : vector<1x128xf32> to vector<8x128xf32>
    %166 = arith.mulf %161, %165 : vector<8x128xf32>
    %167 = vector.broadcast %147 : vector<1x128xf32> to vector<8x128xf32>
    %168 = arith.mulf %166, %167 : vector<8x128xf32>
    %169 = vector.broadcast %148 : vector<1x128xf32> to vector<8x128xf32>
    %170 = arith.addf %168, %169 : vector<8x128xf32>
    %c0_88 = arith.constant 0 : index
    %c0_89 = arith.constant 0 : index
    %171 = vector.load %arg29[%c0_88, %c0_89] : memref<128x128xbf16, #tpu.memory_space<vmem>>, vector<128x128xbf16>
    %172 = arith.truncf %129 : vector<16x128xf32> to vector<16x128xbf16>
    %cst_90 = arith.constant dense<0.000000e+00> : vector<16x128xf32>
    %173 = tpu.matmul %172, %171, %cst_90 {dimension_numbers = #tpu.dot_dimension_numbers<[1], [0], [0], [1], [0, 0, 1, 1], [], []>} : vector<16x128xbf16>, vector<128x128xbf16>, vector<16x128xf32> -> vector<16x128xf32>
    %c0_91 = arith.constant 0 : index
    %c0_92 = arith.constant 0 : index
    %174 = vector.load %arg30[%c0_91, %c0_92] : memref<1x128xf32, #tpu.memory_space<vmem>>, vector<1x128xf32>
    %175 = vector.broadcast %174 : vector<1x128xf32> to vector<16x128xf32>
    %176 = arith.addf %173, %175 : vector<16x128xf32>
    %c0_93 = arith.constant 0 : index
    %c0_94 = arith.constant 0 : index
    %177 = vector.load %arg27[%c0_93, %c0_94] : memref<128x128xbf16, #tpu.memory_space<vmem>>, vector<128x128xbf16>
    %178 = arith.truncf %170 : vector<8x128xf32> to vector<8x128xbf16>
    %cst_95 = arith.constant dense<0.000000e+00> : vector<8x128xf32>
    %179 = tpu.matmul %178, %177, %cst_95 {dimension_numbers = #tpu.dot_dimension_numbers<[1], [0], [0], [1], [0, 0, 1, 1], [], []>} : vector<8x128xbf16>, vector<128x128xbf16>, vector<8x128xf32> -> vector<8x128xf32>
    %c0_96 = arith.constant 0 : index
    %c0_97 = arith.constant 0 : index
    %180 = vector.load %arg28[%c0_96, %c0_97] : memref<128x128xbf16, #tpu.memory_space<vmem>>, vector<128x128xbf16>
    %181 = arith.truncf %129 : vector<16x128xf32> to vector<16x128xbf16>
    %cst_98 = arith.constant dense<0.000000e+00> : vector<16x128xf32>
    %182 = tpu.matmul %181, %180, %cst_98 {dimension_numbers = #tpu.dot_dimension_numbers<[1], [0], [0], [1], [0, 0, 1, 1], [], []>} : vector<16x128xbf16>, vector<128x128xbf16>, vector<16x128xf32> -> vector<16x128xf32>
    %183 = tpu.concatenate %179, %182 in 0 : vector<8x128xf32>, vector<16x128xf32> -> vector<24x128xf32>
    %c0_99 = arith.constant 0 : index
    %c0_100 = arith.constant 0 : index
    %184 = vector.load %arg14[%c0_99, %c0_100] : memref<16x24xf32, #tpu.memory_space<vmem>>, vector<16x24xf32>
    %cst_101 = arith.constant dense<0.000000e+00> : vector<16x128xf32>
    %185 = tpu.matmul %184, %183, %cst_101 {dimension_numbers = #tpu.dot_dimension_numbers<[1], [0], [0], [1], [0, 0, 1, 1], [], []>} : vector<16x24xf32>, vector<24x128xf32>, vector<16x128xf32> -> vector<16x128xf32>
    %186 = arith.addf %176, %185 : vector<16x128xf32>
    %cst_102 = arith.constant 5.000000e-01 : f32
    %187 = vector.broadcast %cst_102 : f32 to vector<16x128xf32>
    %188 = arith.mulf %186, %187 : vector<16x128xf32>
    %cst_103 = arith.constant 0.00999999977 : f32
    %189 = vector.broadcast %cst_103 : f32 to vector<16x128xf32>
    %190 = arith.mulf %189, %188 : vector<16x128xf32>
    %191 = arith.maximumf %188, %190 : vector<16x128xf32>
    %c0_104 = arith.constant 0 : index
    %c0_105 = arith.constant 0 : index
    %192 = vector.load %arg31[%c0_104, %c0_105] : memref<1x128xf32, #tpu.memory_space<vmem>>, vector<1x128xf32>
    %c0_106 = arith.constant 0 : index
    %c0_107 = arith.constant 0 : index
    %193 = vector.load %arg32[%c0_106, %c0_107] : memref<1x128xf32, #tpu.memory_space<vmem>>, vector<1x128xf32>
    %cst_108 = arith.constant dense<0.000000e+00> : vector<128xf32>
    %194 = vector.multi_reduction <add>, %191, %cst_108 [0] : vector<16x128xf32> to vector<128xf32>
    %195 = vector.shape_cast %194 : vector<128xf32> to vector<1x128xf32>
    %cst_109 = arith.constant 1.600000e+01 : f32
    %196 = vector.broadcast %cst_109 : f32 to vector<1x128xf32>
    %197 = arith.divf %195, %196 : vector<1x128xf32>
    %198 = arith.mulf %191, %191 : vector<16x128xf32>
    %cst_110 = arith.constant dense<0.000000e+00> : vector<128xf32>
    %199 = vector.multi_reduction <add>, %198, %cst_110 [0] : vector<16x128xf32> to vector<128xf32>
    %200 = vector.shape_cast %199 : vector<128xf32> to vector<1x128xf32>
    %cst_111 = arith.constant 1.600000e+01 : f32
    %201 = vector.broadcast %cst_111 : f32 to vector<1x128xf32>
    %202 = arith.divf %200, %201 : vector<1x128xf32>
    %203 = arith.mulf %197, %197 : vector<1x128xf32>
    %204 = arith.subf %202, %203 : vector<1x128xf32>
    %205 = vector.broadcast %197 : vector<1x128xf32> to vector<16x128xf32>
    %206 = arith.subf %191, %205 : vector<16x128xf32>
    %cst_112 = arith.constant 9.99999974E-6 : f32
    %207 = vector.broadcast %cst_112 : f32 to vector<1x128xf32>
    %208 = arith.addf %204, %207 : vector<1x128xf32>
    %209 = math.rsqrt %208 : vector<1x128xf32>
    %210 = vector.broadcast %209 : vector<1x128xf32> to vector<16x128xf32>
    %211 = arith.mulf %206, %210 : vector<16x128xf32>
    %212 = vector.broadcast %192 : vector<1x128xf32> to vector<16x128xf32>
    %213 = arith.mulf %211, %212 : vector<16x128xf32>
    %214 = vector.broadcast %193 : vector<1x128xf32> to vector<16x128xf32>
    %215 = arith.addf %213, %214 : vector<16x128xf32>
    %c0_113 = arith.constant 0 : index
    %c0_114 = arith.constant 0 : index
    %216 = vector.load %arg34[%c0_113, %c0_114] : memref<128x128xbf16, #tpu.memory_space<vmem>>, vector<128x128xbf16>
    %217 = arith.truncf %170 : vector<8x128xf32> to vector<8x128xbf16>
    %cst_115 = arith.constant dense<0.000000e+00> : vector<8x128xf32>
    %218 = tpu.matmul %217, %216, %cst_115 {dimension_numbers = #tpu.dot_dimension_numbers<[1], [0], [0], [1], [0, 0, 1, 1], [], []>} : vector<8x128xbf16>, vector<128x128xbf16>, vector<8x128xf32> -> vector<8x128xf32>
    %c0_116 = arith.constant 0 : index
    %c0_117 = arith.constant 0 : index
    %219 = vector.load %arg35[%c0_116, %c0_117] : memref<1x128xf32, #tpu.memory_space<vmem>>, vector<1x128xf32>
    %220 = vector.broadcast %219 : vector<1x128xf32> to vector<8x128xf32>
    %221 = arith.addf %218, %220 : vector<8x128xf32>
    %c0_118 = arith.constant 0 : index
    %c0_119 = arith.constant 0 : index
    %222 = vector.load %arg33[%c0_118, %c0_119] : memref<128x128xbf16, #tpu.memory_space<vmem>>, vector<128x128xbf16>
    %223 = arith.truncf %129 : vector<16x128xf32> to vector<16x128xbf16>
    %cst_120 = arith.constant dense<0.000000e+00> : vector<16x128xf32>
    %224 = tpu.matmul %223, %222, %cst_120 {dimension_numbers = #tpu.dot_dimension_numbers<[1], [0], [0], [1], [0, 0, 1, 1], [], []>} : vector<16x128xbf16>, vector<128x128xbf16>, vector<16x128xf32> -> vector<16x128xf32>
    %c0_121 = arith.constant 0 : index
    %c0_122 = arith.constant 0 : index
    %225 = vector.load %arg15[%c0_121, %c0_122] : memref<8x16xf32, #tpu.memory_space<vmem>>, vector<8x16xf32>
    %cst_123 = arith.constant dense<0.000000e+00> : vector<8x128xf32>
    %226 = tpu.matmul %225, %224, %cst_123 {dimension_numbers = #tpu.dot_dimension_numbers<[1], [0], [0], [1], [0, 0, 1, 1], [], []>} : vector<8x16xf32>, vector<16x128xf32>, vector<8x128xf32> -> vector<8x128xf32>
    %227 = arith.addf %221, %226 : vector<8x128xf32>
    %cst_124 = arith.constant 1.000000e+00 : f32
    %228 = vector.broadcast %cst_124 : f32 to vector<8x128xf32>
    %229 = arith.mulf %227, %228 : vector<8x128xf32>
    %cst_125 = arith.constant 0.00999999977 : f32
    %230 = vector.broadcast %cst_125 : f32 to vector<8x128xf32>
    %231 = arith.mulf %230, %229 : vector<8x128xf32>
    %232 = arith.maximumf %229, %231 : vector<8x128xf32>
    %c0_126 = arith.constant 0 : index
    %c0_127 = arith.constant 0 : index
    %233 = vector.load %arg36[%c0_126, %c0_127] : memref<1x128xf32, #tpu.memory_space<vmem>>, vector<1x128xf32>
    %c0_128 = arith.constant 0 : index
    %c0_129 = arith.constant 0 : index
    %234 = vector.load %arg37[%c0_128, %c0_129] : memref<1x128xf32, #tpu.memory_space<vmem>>, vector<1x128xf32>
    %cst_130 = arith.constant dense<0.000000e+00> : vector<128xf32>
    %235 = vector.multi_reduction <add>, %232, %cst_130 [0] : vector<8x128xf32> to vector<128xf32>
    %236 = vector.shape_cast %235 : vector<128xf32> to vector<1x128xf32>
    %cst_131 = arith.constant 8.000000e+00 : f32
    %237 = vector.broadcast %cst_131 : f32 to vector<1x128xf32>
    %238 = arith.divf %236, %237 : vector<1x128xf32>
    %239 = arith.mulf %232, %232 : vector<8x128xf32>
    %cst_132 = arith.constant dense<0.000000e+00> : vector<128xf32>
    %240 = vector.multi_reduction <add>, %239, %cst_132 [0] : vector<8x128xf32> to vector<128xf32>
    %241 = vector.shape_cast %240 : vector<128xf32> to vector<1x128xf32>
    %cst_133 = arith.constant 8.000000e+00 : f32
    %242 = vector.broadcast %cst_133 : f32 to vector<1x128xf32>
    %243 = arith.divf %241, %242 : vector<1x128xf32>
    %244 = arith.mulf %238, %238 : vector<1x128xf32>
    %245 = arith.subf %243, %244 : vector<1x128xf32>
    %246 = vector.broadcast %238 : vector<1x128xf32> to vector<8x128xf32>
    %247 = arith.subf %232, %246 : vector<8x128xf32>
    %cst_134 = arith.constant 9.99999974E-6 : f32
    %248 = vector.broadcast %cst_134 : f32 to vector<1x128xf32>
    %249 = arith.addf %245, %248 : vector<1x128xf32>
    %250 = math.rsqrt %249 : vector<1x128xf32>
    %251 = vector.broadcast %250 : vector<1x128xf32> to vector<8x128xf32>
    %252 = arith.mulf %247, %251 : vector<8x128xf32>
    %253 = vector.broadcast %233 : vector<1x128xf32> to vector<8x128xf32>
    %254 = arith.mulf %252, %253 : vector<8x128xf32>
    %255 = vector.broadcast %234 : vector<1x128xf32> to vector<8x128xf32>
    %256 = arith.addf %254, %255 : vector<8x128xf32>
    %c0_135 = arith.constant 0 : index
    %c0_136 = arith.constant 0 : index
    %257 = vector.load %arg38[%c0_135, %c0_136] : memref<16x128xf32, #tpu.memory_space<vmem>>, vector<16x128xf32>
    tpu.vector_store %arg38[%c0_135, %c0_136], %215 {strides = array<i32>} : memref<16x128xf32, #tpu.memory_space<vmem>>, vector<16x128xf32>,
    %c0_137 = arith.constant 0 : index
    %c0_138 = arith.constant 0 : index
    %258 = vector.load %arg39[%c0_137, %c0_138] : memref<8x128xf32, #tpu.memory_space<vmem>>, vector<8x128xf32>
    tpu.vector_store %arg39[%c0_137, %c0_138], %256 {strides = array<i32>} : memref<8x128xf32, #tpu.memory_space<vmem>>, vector<8x128xf32>,
    %c0_139 = arith.constant 0 : index
    %c0_140 = arith.constant 0 : index
    %259 = vector.load %arg40[%c0_139, %c0_140] : memref<8x128xf32, #tpu.memory_space<vmem>>, vector<8x128xf32>
    tpu.vector_store %arg40[%c0_139, %c0_140], %84 {strides = array<i32>} : memref<8x128xf32, #tpu.memory_space<vmem>>, vector<8x128xf32>,
    return
  }
  func.func @transform_0(%arg0: i32) -> (i32, i32) {
    %c0_i32 = arith.constant 0 : i32
    %c0_i32_0 = arith.constant 0 : i32
    %c0_i32_1 = arith.constant 0 : i32
    return %c0_i32, %c0_i32_0 : i32, i32
  }
  func.func @transform_1(%arg0: i32) -> (i32, i32) {
    %c0_i32 = arith.constant 0 : i32
    %c0_i32_0 = arith.constant 0 : i32
    %c0_i32_1 = arith.constant 0 : i32
    return %c0_i32, %c0_i32_0 : i32, i32
  }
  func.func @transform_2(%arg0: i32) -> (i32, i32) {
    %c0_i32 = arith.constant 0 : i32
    %c0_i32_0 = arith.constant 0 : i32
    %c0_i32_1 = arith.constant 0 : i32
    return %c0_i32, %c0_i32_0 : i32, i32
  }
  func.func @transform_3(%arg0: i32) -> (i32, i32) {
    %c0_i32 = arith.constant 0 : i32
    %c0_i32_0 = arith.constant 0 : i32
    %c0_i32_1 = arith.constant 0 : i32
    return %c0_i32, %c0_i32_0 : i32, i32
  }
  func.func @transform_4(%arg0: i32) -> (i32, i32) {
    %c0_i32 = arith.constant 0 : i32
    %c0_i32_0 = arith.constant 0 : i32
    %c0_i32_1 = arith.constant 0 : i32
    return %c0_i32, %c0_i32_0 : i32, i32
  }
  func.func @transform_5(%arg0: i32) -> (i32, i32) {
    %c0_i32 = arith.constant 0 : i32
    %c0_i32_0 = arith.constant 0 : i32
    %c0_i32_1 = arith.constant 0 : i32
    return %c0_i32, %c0_i32_0 : i32, i32
  }
  func.func @transform_6(%arg0: i32) -> (i32, i32) {
    %c0_i32 = arith.constant 0 : i32
    %c0_i32_0 = arith.constant 0 : i32
    %c0_i32_1 = arith.constant 0 : i32
    return %c0_i32, %c0_i32_0 : i32, i32
  }
  func.func @transform_7(%arg0: i32) -> (i32, i32) {
    %c0_i32 = arith.constant 0 : i32
    %c0_i32_0 = arith.constant 0 : i32
    %c0_i32_1 = arith.constant 0 : i32
    return %c0_i32, %c0_i32_0 : i32, i32
  }
  func.func @transform_8(%arg0: i32) -> (i32, i32) {
    %c0_i32 = arith.constant 0 : i32
    %c0_i32_0 = arith.constant 0 : i32
    %c0_i32_1 = arith.constant 0 : i32
    return %c0_i32, %c0_i32_0 : i32, i32
  }
  func.func @transform_9(%arg0: i32) -> (i32, i32) {
    %c0_i32 = arith.constant 0 : i32
    %c0_i32_0 = arith.constant 0 : i32
    %c0_i32_1 = arith.constant 0 : i32
    return %c0_i32, %c0_i32_0 : i32, i32
  }
  func.func @transform_10(%arg0: i32) -> (i32, i32) {
    %c0_i32 = arith.constant 0 : i32
    %c0_i32_0 = arith.constant 0 : i32
    %c0_i32_1 = arith.constant 0 : i32
    return %c0_i32, %c0_i32_0 : i32, i32
  }
  func.func @transform_11(%arg0: i32) -> (i32, i32) {
    %c0_i32 = arith.constant 0 : i32
    %c0_i32_0 = arith.constant 0 : i32
    %c0_i32_1 = arith.constant 0 : i32
    return %c0_i32, %c0_i32_0 : i32, i32
  }
  func.func @transform_12(%arg0: i32) -> (i32, i32) {
    %c0_i32 = arith.constant 0 : i32
    %c0_i32_0 = arith.constant 0 : i32
    %c0_i32_1 = arith.constant 0 : i32
    return %c0_i32, %c0_i32_0 : i32, i32
  }
  func.func @transform_13(%arg0: i32) -> (i32, i32) {
    %c0_i32 = arith.constant 0 : i32
    %c0_i32_0 = arith.constant 0 : i32
    %c0_i32_1 = arith.constant 0 : i32
    return %c0_i32, %c0_i32_0 : i32, i32
  }
  func.func @transform_14(%arg0: i32) -> (i32, i32) {
    %c0_i32 = arith.constant 0 : i32
    %c0_i32_0 = arith.constant 0 : i32
    %c0_i32_1 = arith.constant 0 : i32
    return %c0_i32, %c0_i32_0 : i32, i32
  }
  func.func @transform_15(%arg0: i32) -> (i32, i32) {
    %c0_i32 = arith.constant 0 : i32
    %c0_i32_0 = arith.constant 0 : i32
    %c0_i32_1 = arith.constant 0 : i32
    return %c0_i32, %c0_i32_0 : i32, i32
  }
  func.func @transform_16(%arg0: i32) -> (i32, i32) {
    %c0_i32 = arith.constant 0 : i32
    %c0_i32_0 = arith.constant 0 : i32
    %c0_i32_1 = arith.constant 0 : i32
    return %c0_i32, %c0_i32_0 : i32, i32
  }
  func.func @transform_17(%arg0: i32) -> (i32, i32) {
    %c0_i32 = arith.constant 0 : i32
    %c0_i32_0 = arith.constant 0 : i32
    %c0_i32_1 = arith.constant 0 : i32
    return %c0_i32, %c0_i32_0 : i32, i32
  }
  func.func @transform_18(%arg0: i32) -> (i32, i32) {
    %c0_i32 = arith.constant 0 : i32
    %c0_i32_0 = arith.constant 0 : i32
    %c0_i32_1 = arith.constant 0 : i32
    return %c0_i32, %c0_i32_0 : i32, i32
  }
  func.func @transform_19(%arg0: i32) -> (i32, i32) {
    %c0_i32 = arith.constant 0 : i32
    %c0_i32_0 = arith.constant 0 : i32
    %c0_i32_1 = arith.constant 0 : i32
    return %c0_i32, %c0_i32_0 : i32, i32
  }
  func.func @transform_20(%arg0: i32) -> (i32, i32) {
    %c0_i32 = arith.constant 0 : i32
    %c0_i32_0 = arith.constant 0 : i32
    %c0_i32_1 = arith.constant 0 : i32
    return %c0_i32, %c0_i32_0 : i32, i32
  }
  func.func @transform_21(%arg0: i32) -> (i32, i32) {
    %c0_i32 = arith.constant 0 : i32
    %c0_i32_0 = arith.constant 0 : i32
    %c0_i32_1 = arith.constant 0 : i32
    return %c0_i32, %c0_i32_0 : i32, i32
  }
  func.func @transform_22(%arg0: i32) -> (i32, i32) {
    %c0_i32 = arith.constant 0 : i32
    %c0_i32_0 = arith.constant 0 : i32
    %c0_i32_1 = arith.constant 0 : i32
    return %c0_i32, %c0_i32_0 : i32, i32
  }
  func.func @transform_23(%arg0: i32) -> (i32, i32) {
    %c0_i32 = arith.constant 0 : i32
    %c0_i32_0 = arith.constant 0 : i32
    %c0_i32_1 = arith.constant 0 : i32
    return %c0_i32, %c0_i32_0 : i32, i32
  }
  func.func @transform_24(%arg0: i32) -> (i32, i32) {
    %c0_i32 = arith.constant 0 : i32
    %c0_i32_0 = arith.constant 0 : i32
    %c0_i32_1 = arith.constant 0 : i32
    return %c0_i32, %c0_i32_0 : i32, i32
  }
  func.func @transform_25(%arg0: i32) -> (i32, i32) {
    %c0_i32 = arith.constant 0 : i32
    %c0_i32_0 = arith.constant 0 : i32
    %c0_i32_1 = arith.constant 0 : i32
    return %c0_i32, %c0_i32_0 : i32, i32
  }
  func.func @transform_26(%arg0: i32) -> (i32, i32) {
    %c0_i32 = arith.constant 0 : i32
    %c0_i32_0 = arith.constant 0 : i32
    %c0_i32_1 = arith.constant 0 : i32
    return %c0_i32, %c0_i32_0 : i32, i32
  }
  func.func @transform_27(%arg0: i32) -> (i32, i32) {
    %c0_i32 = arith.constant 0 : i32
    %c0_i32_0 = arith.constant 0 : i32
    %c0_i32_1 = arith.constant 0 : i32
    return %c0_i32, %c0_i32_0 : i32, i32
  }
  func.func @transform_28(%arg0: i32) -> (i32, i32) {
    %c0_i32 = arith.constant 0 : i32
    %c0_i32_0 = arith.constant 0 : i32
    %c0_i32_1 = arith.constant 0 : i32
    return %c0_i32, %c0_i32_0 : i32, i32
  }
  func.func @transform_29(%arg0: i32) -> (i32, i32) {
    %c0_i32 = arith.constant 0 : i32
    %c0_i32_0 = arith.constant 0 : i32
    %c0_i32_1 = arith.constant 0 : i32
    return %c0_i32, %c0_i32_0 : i32, i32
  }
  func.func @transform_30(%arg0: i32) -> (i32, i32) {
    %c0_i32 = arith.constant 0 : i32
    %c0_i32_0 = arith.constant 0 : i32
    %c0_i32_1 = arith.constant 0 : i32
    return %c0_i32, %c0_i32_0 : i32, i32
  }
  func.func @transform_31(%arg0: i32) -> (i32, i32) {
    %c0_i32 = arith.constant 0 : i32
    %c0_i32_0 = arith.constant 0 : i32
    %c0_i32_1 = arith.constant 0 : i32
    return %c0_i32, %c0_i32_0 : i32, i32
  }
  func.func @transform_32(%arg0: i32) -> (i32, i32) {
    %c0_i32 = arith.constant 0 : i32
    %c0_i32_0 = arith.constant 0 : i32
    %c0_i32_1 = arith.constant 0 : i32
    return %c0_i32, %c0_i32_0 : i32, i32
  }
  func.func @transform_33(%arg0: i32) -> (i32, i32) {
    %c0_i32 = arith.constant 0 : i32
    %c0_i32_0 = arith.constant 0 : i32
    %c0_i32_1 = arith.constant 0 : i32
    return %c0_i32, %c0_i32_0 : i32, i32
  }
  func.func @transform_34(%arg0: i32) -> (i32, i32) {
    %c0_i32 = arith.constant 0 : i32
    %c0_i32_0 = arith.constant 0 : i32
    %c0_i32_1 = arith.constant 0 : i32
    return %c0_i32, %c0_i32_0 : i32, i32
  }
  func.func @transform_35(%arg0: i32) -> (i32, i32) {
    %c0_i32 = arith.constant 0 : i32
    %c0_i32_0 = arith.constant 0 : i32
    %c0_i32_1 = arith.constant 0 : i32
    return %c0_i32, %c0_i32_0 : i32, i32
  }
  func.func @transform_36(%arg0: i32) -> (i32, i32) {
    %c0_i32 = arith.constant 0 : i32
    %c0_i32_0 = arith.constant 0 : i32
    %c0_i32_1 = arith.constant 0 : i32
    return %c0_i32, %c0_i32_0 : i32, i32
  }
  func.func @transform_37(%arg0: i32) -> (i32, i32) {
    %c0_i32 = arith.constant 0 : i32
    %c0_i32_0 = arith.constant 0 : i32
    %c0_i32_1 = arith.constant 0 : i32
    return %c0_i32, %c0_i32_0 : i32, i32
  }
  func.func @transform_38(%arg0: i32) -> (i32, i32) {
    %c0_i32 = arith.constant 0 : i32
    %c0_i32_0 = arith.constant 0 : i32
    %c0_i32_1 = arith.constant 0 : i32
    return %c0_i32, %c0_i32_0 : i32, i32
  }
  func.func @transform_39(%arg0: i32) -> (i32, i32) {
    %c0_i32 = arith.constant 0 : i32
    %c0_i32_0 = arith.constant 0 : i32
    %c0_i32_1 = arith.constant 0 : i32
    return %c0_i32, %c0_i32_0 : i32, i32
  }
}

</mosaic_0001>

<bundles_post_ra>
// kernel: forward.1
= control target key start
LH: loop header
LB: loop body
LE: loop exit
PB: predicated region body
PF: predicated region fallthrough
CT: control target
= control target key end

     0   :  { %s3356_s6 = smov 1   ;;  %s3357_s10 = smov 2   ;;  %s3958_s0 = inlined_call_operand.smem [shape: u32[40], index: -1, kind: input, shape index: {}] }
   0x1   :  { %s3442_s5 = sld [smem:[%s3958_s0]]   ;;  %s3358_s14 = smov 3  }
   0x2   :  { %s3447_s9 = sld [smem:[%s3958_s0 + %s3356_s6]]   ;;  %s3359_s18 = smov 4  }
   0x3   :  { %s3452_s13 = sld [smem:[%s3958_s0 + %s3357_s10]]   ;;  %s3360_s22 = smov 5  }
   0x4   :  { %s3457_s17 = sld [smem:[%s3958_s0 + %s3358_s14]]   ;;  %s3361_s26 = smov 6  }
   0x5   :  { %s3462_s21 = sld [smem:[%s3958_s0 + %s3359_s18]]   ;;  %s3362_s30 = smov 7  }
   0x6   :  { %s3467_s25 = sld [smem:[%s3958_s0 + %s3360_s22]]   ;;  %s3363_s4 = smov 8  }
   0x7   :  { %3976 = sst [smem:[#allocation71_spill]] %s3442_s5  ;;  %s3364_s10 = smov 9  }
   0x8   :  { %3977 = sst [smem:[#allocation72_spill]] %s3447_s9  ;;  %s3365_s15 = smov 10  }
   0x9   :  { %s3472_s29 = sld [smem:[%s3958_s0 + %s3361_s26]]   ;;  %s3366_s20 = smov 11  }
   0xa   :  { %3978 = sst [smem:[#allocation73_spill]] %s3457_s17  ;;  %s3367_s26 = smov 12  }
   0xb   :  { %s3477_s3 = sld [smem:[%s3958_s0 + %s3362_s30]]   ;;  %s3368_s1 = smov 13  }
   0xc   :  { %3979 = sst [smem:[#allocation74_spill]] %s3467_s25  ;;  %s3369_s7 = smov 14  }
   0xd   :  { %s3482_s8 = sld [smem:[%s3958_s0 + %s3363_s4]]   ;;  %s3371_s22 = smov 16  }
   0xe   :  { %s3487_s14 = sld [smem:[%s3958_s0 + %s3364_s10]]   ;;  %s3372_s28 = smov 17  }
   0xf   :  { %3980 = sst [smem:[#allocation75_spill]] %s3472_s29 }
  0x10   :  { %s3492_s19 = sld [smem:[%s3958_s0 + %s3365_s15]]   ;;  %s3370_s15 = smov 15  }
  0x11   :  { %s3497_s24 = sld [smem:[%s3958_s0 + %s3366_s20]]  }
  0x12   :  { %s3502_s30 = sld [smem:[%s3958_s0 + %s3367_s26]]  }
  0x13   :  { %3981 = sst [smem:[#allocation76_spill]] %s3482_s8 }
  0x14   :  { %3982 = sst [smem:[#allocation77_spill]] %s3487_s14 }
  0x15   :  { %s3507_s6 = sld [smem:[%s3958_s0 + %s3368_s1]]  }
  0x16   :  { %3983 = sst [smem:[#allocation78_spill]] %s3492_s19 }
  0x17   :  { %3984 = sst [smem:[#allocation79_spill]] %s3497_s24 }
  0x18   :  { %s3512_s12 = sld [smem:[%s3958_s0 + %s3369_s7]]   ;;  %s3373_s7 = smov 18  }
  0x19   :  { %s3517_s20 = sld [smem:[%s3958_s0 + %s3370_s15]]   ;;  %s3374_s15 = smov 19  }
  0x1a   :  { %s3522_s27 = sld [smem:[%s3958_s0 + %s3371_s22]]   ;;  %s3375_s22 = smov 20  }
  0x1b   :  { %3985 = sst [smem:[#allocation80_spill]] %s3507_s6 }
  0x1c   :  { %s3527_s4 = sld [smem:[%s3958_s0 + %s3372_s28]]   ;;  %s3376_s28 = smov 21  }
  0x1d   :  { %s3532_s19 = sld [smem:[%s3958_s0 + %s3373_s7]]   ;;  %s3377_s7 = smov 22  }
  0x1e   :  { %3986 = sst [smem:[#allocation81_spill]] %s3512_s12 }
  0x1f   :  { %3987 = sst [smem:[#allocation82_spill]] %s3517_s20 }
  0x20   :  { %s3537_s12 = sld [smem:[%s3958_s0 + %s3374_s15]]   ;;  %s3378_s15 = smov 23  }
  0x21   :  { %s3542_s6 = sld [smem:[%s3958_s0 + %s3375_s22]]   ;;  %s3379_s22 = smov 24  }
  0x22   :  { %3988 = sst [smem:[#allocation83_spill]] %s3527_s4 }
  0x23   :  { %s3547_s8 = sld [smem:[%s3958_s0 + %s3376_s28]]   ;;  %s3380_s28 = smov 25  }
  0x24   :  { %s3552_s14 = sld [smem:[%s3958_s0 + %s3377_s7]]   ;;  %s3381_s7 = smov 26  }
  0x25   :  { %s3557_s25 = sld [smem:[%s3958_s0 + %s3378_s15]]   ;;  %s3382_s15 = smov 27  }
  0x26   :  { %3989 = sst [smem:[#allocation84_spill]] %s3537_s12 }
  0x27   :  { %s3562_s5 = sld [smem:[%s3958_s0 + %s3379_s22]]   ;;  %s3383_s22 = smov 28  }
  0x28   :  { %s3572_s12 = sld [smem:[%s3958_s0 + %s3381_s7]]   ;;  %s3385_s7 = smov 30  }
  0x29   :  { %3990 = sst [smem:[#allocation85_spill]] %s3547_s8 }
  0x2a   :  { %s3567_s8 = sld [smem:[%s3958_s0 + %s3380_s28]]   ;;  %s3384_s28 = smov 29  }
  0x2b   :  { %3991 = sst [smem:[#allocation86_spill]] %s3557_s25 }
  0x2c   :  { %s3577_s25 = sld [smem:[%s3958_s0 + %s3382_s15]]   ;;  %s3386_s15 = smov 31  }
  0x2d   :  { %s3582_s4 = sld [smem:[%s3958_s0 + %s3383_s22]]   ;;  %s3387_s22 = smov 32  }
  0x2e   :  { %s3592_s20 = sld [smem:[%s3958_s0 + %s3385_s7]]   ;;  %s3389_s7 = smov 34  }
  0x2f   :  { %s3602_s24 = sld [smem:[%s3958_s0 + %s3387_s22]]   ;;  %s3391_s22 = smov 36  }
  0x30   :  { %3992 = sst [smem:[#allocation87_spill]] %s3567_s8 }
  0x31   :  { %s3587_s8 = sld [smem:[%s3958_s0 + %s3384_s28]]   ;;  %s3388_s28 = smov 33  }
  0x32   :  { %3993 = sst [smem:[#allocation88_spill]] %s3577_s25 }
  0x33   :  { %s3597_s25 = sld [smem:[%s3958_s0 + %s3386_s15]]   ;;  %s3390_s15 = smov 35  }
  0x34   :  { %s3612_s29 = sld [smem:[%s3958_s0 + %s3389_s7]]   ;;  %s3393_s7 = smov 38  }
  0x35   :  { %s3622_s17 = sld [smem:[%s3958_s0 + %s3391_s22]]  }
  0x36   :  { %s3632_s9 = sld [smem:[%s3958_s0 + %s3393_s7]]  }
  0x37   :  { %3994 = sst [smem:[#allocation89_spill]] %s3587_s8 }
  0x38   :  { %s3607_s8 = sld [smem:[%s3958_s0 + %s3388_s28]]   ;;  %s3392_s28 = smov 37  }
  0x39   :  { %3995 = sst [smem:[#allocation90_spill]] %s3597_s25 }
  0x3a   :  { %s3617_s25 = sld [smem:[%s3958_s0 + %s3390_s15]]   ;;  %s3394_s15 = smov 39  }
  0x3e   :  { %3996 = sst [smem:[#allocation91_spill]] %s3607_s8 }
  0x3f   :  { %s3627_s8 = sld [smem:[%s3958_s0 + %s3392_s28]]  }
  0x40   :  { %3997 = sst [smem:[#allocation92_spill]] %s3617_s25 }
  0x41   :  { %s3637_s25 = sld [smem:[%s3958_s0 + %s3394_s15]]  }
  0x42   :  { %85 = vsyncpa [#allocation3], 0 }
  0x43   :  { %86 = vsyncpa [#allocation6], 0 }
  0x44   :  { %87 = vsyncpa [#allocation9], 0 }
  0x45   :  { %88 = vsyncpa [#allocation12], 0 }
  0x46   :  { %89 = vsyncpa [#allocation15], 0 }
  0x47   :  { %90 = vsyncpa [#allocation18], 0 }
  0x48   :  { %91 = vsyncpa [#allocation21], 0 }
  0x49   :  { %92 = vsyncpa [#allocation24], 0 }
  0x4a   :  { %93 = vsyncpa [#allocation27], 0 }
  0x4b   :  { %94 = vsyncpa [#allocation30], 0 }
  0x4c   :  { %95 = vsyncpa [#allocation33], 0 }
  0x4d   :  { %96 = vsyncpa [#allocation36], 0 }
  0x4e   :  { %97 = vsyncpa [#allocation39], 0 }
  0x4f   :  { %98 = vsyncpa [#allocation42], 0 }
  0x50   :  { %99 = vsyncpa [#allocation45], 0 }
  0x51   :  { %100 = vsyncpa [#allocation48], 0 }
  0x52   :  { %101 = vsyncpa [#allocation4], 0  ;;  %s123_s0 = sshll.u32 %s3452_s13, 4  ;;  %s124_s0 = int_to_ptr.hbm [resolvable:$true] %s123_s0 }
  0x53   :  { %102 = vsyncpa [#allocation51], 0  ;;  %s3395_s22 = smov [#allocation5]   ;;  %s145_s26 = sshll.u32 %s3462_s21, 4  ;;  %s146_s26 = int_to_ptr.hbm [resolvable:$true] %s145_s26 }
  0x54   :  { %s125_s23 = sshll.u32 %s3395_s22, 4  ;;  %s2528_s28 = sshra.s32 %s124_s0, 4  ;;  %s126_s23 = int_to_ptr.vmem [resolvable:$true] %s125_s23  ;;  %s2529_s28 = int_to_ptr.hbm [resolvable:$true] %s2528_s28 }
  0x55   :  { %s2530_s1 = scalar_lea.hbm %s2529_s28, 1  ;;  %s2532_s2 = scalar_lea.hbm %s3452_s13, 1 }
  0x56   :  { %p2531_p0 = scmp.ne.s32.totalorder %s2529_s28, %s2530_s1  ;;  %p2533_p1 = scmp.lt.s32.totalorder %s2529_s28, %s3452_s13 }
  0x57   :  { %p2534_p2 = scmp.lt.s32.totalorder %s2532_s2, %s2530_s1 }
  0x59   :  { %p2535_p3 = por %p2534_p2, %p2533_p1 }
  0x5b   :  { %p2536_p4 = pnand %p2535_p3, %p2531_p0 }
  0x5d   :  { %2539 = shalt.err (!%p2536_p4)
}
  0x5e   :  { %128 = dma.hbm_to_vmem [thread:$0]  %s124_s0, 16, %s126_s23, [#allocation6]  }
  0x5f   :  { %s3396_s7 = smov [#allocation8]   ;;  %s169_s11 = sshll.u32 %s3477_s3, 4  ;;  %s170_s11 = int_to_ptr.hbm [resolvable:$true] %s169_s11 }
  0x60   :  { %s147_s10 = sshll.u32 %s3396_s7, 4  ;;  %s2552_s15 = sshra.s32 %s146_s26, 4  ;;  %s148_s10 = int_to_ptr.vmem [resolvable:$true] %s147_s10  ;;  %s2553_s15 = int_to_ptr.hbm [resolvable:$true] %s2552_s15 }
  0x61   :  { %s2554_s16 = scalar_lea.hbm %s2553_s15, 1  ;;  %s2556_s18 = scalar_lea.hbm %s3462_s21, 1 }
  0x62   :  { %p2555_p5 = scmp.ne.s32.totalorder %s2553_s15, %s2554_s16  ;;  %p2557_p6 = scmp.lt.s32.totalorder %s2553_s15, %s3462_s21 }
  0x63   :  { %p2558_p7 = scmp.lt.s32.totalorder %s2556_s18, %s2554_s16 }
  0x65   :  { %p2559_p8 = por %p2558_p7, %p2557_p6 }
  0x67   :  { %p2560_p9 = pnand %p2559_p8, %p2555_p5 }
  0x69   :  { %2563 = shalt.err (!%p2560_p9)
}
  0x6a   :  { %150 = dma.hbm_to_vmem [thread:$0]  %s146_s26, 16, %s148_s10, [#allocation9]  }
  0x6b   :  { %s197_s13 = sshll.u32 %s3502_s30, 4  ;;  %s3397_s0 = smov [#allocation11]   ;;  %s198_s13 = int_to_ptr.hbm [resolvable:$true] %s197_s13 }
  0x6c   :  { %s171_s22 = sshll.u32 %s3397_s0, 4  ;;  %s2576_s23 = sshra.s32 %s170_s11, 4  ;;  %s172_s22 = int_to_ptr.vmem [resolvable:$true] %s171_s22  ;;  %s2577_s23 = int_to_ptr.hbm [resolvable:$true] %s2576_s23 }
  0x6d   :  { %s2578_s28 = scalar_lea.hbm %s2577_s23, 1  ;;  %s2580_s1 = scalar_lea.hbm %s3477_s3, 1 }
  0x6e   :  { %p2579_p10 = scmp.ne.s32.totalorder %s2577_s23, %s2578_s28  ;;  %p2581_p11 = scmp.lt.s32.totalorder %s2577_s23, %s3477_s3 }
  0x6f   :  { %p2582_p12 = scmp.lt.s32.totalorder %s2580_s1, %s2578_s28 }
  0x71   :  { %p2583_p13 = por %p2582_p12, %p2581_p11 }
  0x73   :  { %p2584_p0 = pnand %p2583_p13, %p2579_p10 }
  0x75   :  { %2587 = shalt.err (!%p2584_p0)
}
  0x76   :  { %174 = dma.hbm_to_vmem [thread:$0]  %s170_s11, 16, %s172_s22, [#allocation12]  }
  0x77   :  { %s3398_s21 = smov [#allocation14]   ;;  %s2600_s2 = sshra.s32 %s198_s13, 4  ;;  %s2601_s2 = int_to_ptr.hbm [resolvable:$true] %s2600_s2 }
  0x78   :  { %s199_s26 = sshll.u32 %s3398_s21, 4  ;;  %s2602_s7 = scalar_lea.hbm %s2601_s2, 1  ;;  %s200_s26 = int_to_ptr.vmem [resolvable:$true] %s199_s26 }
  0x79   :  { %p2603_p1 = scmp.ne.s32.totalorder %s2601_s2, %s2602_s7  ;;  %s2604_s10 = scalar_lea.hbm %s3502_s30, 1 }
  0x7a   :  { %p2605_p2 = scmp.lt.s32.totalorder %s2601_s2, %s3502_s30  ;;  %p2606_p3 = scmp.lt.s32.totalorder %s2604_s10, %s2602_s7 }
  0x7c   :  { %p2607_p4 = por %p2606_p3, %p2605_p2 }
  0x7e   :  { %p2608_p5 = pnand %p2607_p4, %p2603_p1 }
  0x80   :  { %2611 = shalt.err (!%p2608_p5)
}
  0x81   :  { %202 = dma.hbm_to_vmem [thread:$0]  %s198_s13, 16, %s200_s26, [#allocation15]  }
  0x82   :  { %s224_s3 = sshll.u32 %s3522_s27, 4  ;;  %s3399_s11 = smov [#allocation17]   ;;  %s225_s3 = int_to_ptr.hbm [resolvable:$true] %s224_s3 }
  0x83   :  { %s226_s15 = sshll.u32 %s3399_s11, 4  ;;  %s251_s16 = sshll.u32 %s3532_s19, 4  ;;  %s227_s15 = int_to_ptr.vmem [resolvable:$true] %s226_s15  ;;  %s252_s16 = int_to_ptr.hbm [resolvable:$true] %s251_s16 }
  0x84   :  { %s2624_s18 = sshra.s32 %s225_s3, 4  ;;  %s2628_s30 = scalar_lea.hbm %s3522_s27, 64  ;;  %s2625_s18 = int_to_ptr.hbm [resolvable:$true] %s2624_s18 }
  0x85   :  { %s2626_s0 = scalar_lea.hbm %s2625_s18, 64  ;;  %p2629_p7 = scmp.lt.s32.totalorder %s2625_s18, %s3522_s27 }
  0x86   :  { %p2627_p6 = scmp.ne.s32.totalorder %s2625_s18, %s2626_s0  ;;  %p2630_p8 = scmp.lt.s32.totalorder %s2628_s30, %s2626_s0 }
  0x88   :  { %p2631_p9 = por %p2630_p8, %p2629_p7 }
  0x8a   :  { %p2632_p10 = pnand %p2631_p9, %p2627_p6 }
  0x8c   :  { %2635 = shalt.err (!%p2632_p10)
}
  0x8d   :  { %s3400_s13 = smov 64   ;;  %s3401_s22 = smov 4  }
  0x8e   :  { %232 = dma.hbm_to_vmem [thread:$0]  %s225_s3, 1024, %s227_s15, [#allocation18], %s3400_s13, %s3400_s13, %s3401_s22  }
  0x8f   :  { %s3402_s23 = smov [#allocation20]   ;;  %s273_s1 = sshll.u32 %s3542_s6, 4  ;;  %s274_s1 = int_to_ptr.hbm [resolvable:$true] %s273_s1 }
  0x90   :  { %s253_s28 = sshll.u32 %s3402_s23, 4  ;;  %s2648_s27 = sshra.s32 %s252_s16, 4  ;;  %s254_s28 = int_to_ptr.vmem [resolvable:$true] %s253_s28  ;;  %s2649_s27 = int_to_ptr.hbm [resolvable:$true] %s2648_s27 }
  0x91   :  { %s2650_s21 = scalar_lea.hbm %s2649_s27, 1  ;;  %s2652_s26 = scalar_lea.hbm %s3532_s19, 1 }
  0x92   :  { %p2651_p11 = scmp.ne.s32.totalorder %s2649_s27, %s2650_s21  ;;  %p2653_p12 = scmp.lt.s32.totalorder %s2649_s27, %s3532_s19 }
  0x93   :  { %p2654_p13 = scmp.lt.s32.totalorder %s2652_s26, %s2650_s21 }
  0x95   :  { %p2655_p0 = por %p2654_p13, %p2653_p12 }
  0x97   :  { %p2656_p1 = pnand %p2655_p0, %p2651_p11 }
  0x99   :  { %2659 = shalt.err (!%p2656_p1)
}
  0x9a   :  { %256 = dma.hbm_to_vmem [thread:$0]  %s252_s16, 16, %s254_s28, [#allocation21]  }
  0x9b   :  { %s296_s2 = sshll.u32 %s3552_s14, 4  ;;  %s3403_s7 = smov [#allocation23]   ;;  %s3662_s2 = int_to_ptr.hbm [resolvable:$true] %s296_s2 }
  0x9c   :  { %s275_s10 = sshll.u32 %s3403_s7, 4  ;;  %s2672_s3 = sshra.s32 %s274_s1, 4  ;;  %s276_s10 = int_to_ptr.vmem [resolvable:$true] %s275_s10  ;;  %s2673_s3 = int_to_ptr.hbm [resolvable:$true] %s2672_s3 }
  0x9d   :  { %s2674_s11 = scalar_lea.hbm %s2673_s3, 1  ;;  %s2676_s15 = scalar_lea.hbm %s3542_s6, 1 }
  0x9e   :  { %p2675_p2 = scmp.ne.s32.totalorder %s2673_s3, %s2674_s11  ;;  %p2677_p3 = scmp.lt.s32.totalorder %s2673_s3, %s3542_s6 }
  0x9f   :  { %p2678_p4 = scmp.lt.s32.totalorder %s2676_s15, %s2674_s11 }
  0xa1   :  { %p2679_p5 = por %p2678_p4, %p2677_p3 }
  0xa3   :  { %p2680_p6 = pnand %p2679_p5, %p2675_p2 }
  0xa5   :  { %2683 = shalt.err (!%p2680_p6)
}
  0xa6   :  { %278 = dma.hbm_to_vmem [thread:$0]  %s274_s1, 16, %s276_s10, [#allocation24]  }
  0xa7   :  { %s3404_s19 = smov [#allocation26]   ;;  %s321_s18 = sshll.u32 %s3562_s5, 4  ;;  %s322_s18 = int_to_ptr.hbm [resolvable:$true] %s321_s18 }
  0xa8   :  { %s298_s16 = sshll.u32 %s3404_s19, 4  ;;  %s2696_s0 = sshra.s32 %s3662_s2, 4  ;;  %s299_s16 = int_to_ptr.vmem [resolvable:$true] %s298_s16  ;;  %s2697_s0 = int_to_ptr.hbm [resolvable:$true] %s2696_s0 }
  0xa9   :  { %s2698_s30 = scalar_lea.hbm %s2697_s0, 64  ;;  %s2700_s23 = scalar_lea.hbm %s3552_s14, 64 }
  0xaa   :  { %p2699_p7 = scmp.ne.s32.totalorder %s2697_s0, %s2698_s30  ;;  %p2701_p8 = scmp.lt.s32.totalorder %s2697_s0, %s3552_s14 }
  0xab   :  { %p2702_p9 = scmp.lt.s32.totalorder %s2700_s23, %s2698_s30 }
  0xad   :  { %p2703_p10 = por %p2702_p9, %p2701_p8 }
  0xaf   :  { %p2704_p11 = pnand %p2703_p10, %p2699_p7 }
  0xb1   :  { %2707 = shalt.err (!%p2704_p11)
}
  0xb2   :  { %304 = dma.hbm_to_vmem [thread:$0]  %s3662_s2, 1024, %s299_s16, [#allocation27], %s3400_s13, %s3400_s13, %s3401_s22  }
  0xb3   :  { %s342_s6 = sshll.u32 %s3572_s12, 4  ;;  %s3405_s28 = smov [#allocation29]   ;;  %s3675_s6 = int_to_ptr.hbm [resolvable:$true] %s342_s6 }
  0xb4   :  { %s323_s1 = sshll.u32 %s3405_s28, 4  ;;  %s2720_s27 = sshra.s32 %s322_s18, 4  ;;  %s324_s1 = int_to_ptr.vmem [resolvable:$true] %s323_s1  ;;  %s2721_s27 = int_to_ptr.hbm [resolvable:$true] %s2720_s27 }
  0xb5   :  { %s2722_s14 = scalar_lea.hbm %s2721_s27, 1  ;;  %s2724_s21 = scalar_lea.hbm %s3562_s5, 1 }
  0xb6   :  { %p2723_p12 = scmp.ne.s32.totalorder %s2721_s27, %s2722_s14  ;;  %p2725_p13 = scmp.lt.s32.totalorder %s2721_s27, %s3562_s5 }
  0xb7   :  { %p2726_p0 = scmp.lt.s32.totalorder %s2724_s21, %s2722_s14 }
  0xb9   :  { %p2727_p1 = por %p2726_p0, %p2725_p13 }
  0xbb   :  { %p2728_p2 = pnand %p2727_p1, %p2723_p12 }
  0xbd   :  { %2731 = shalt.err (!%p2728_p2)
}
  0xbe   :  { %326 = dma.hbm_to_vmem [thread:$0]  %s322_s18, 16, %s324_s1, [#allocation30]  }
  0xbf   :  { %s3406_s26 = smov [#allocation32]   ;;  %s368_s7 = sshll.u32 %s3582_s4, 4  ;;  %s3680_s7 = int_to_ptr.hbm [resolvable:$true] %s368_s7 }
  0xc0   :  { %s344_s2 = sshll.u32 %s3406_s26, 4  ;;  %s2744_s10 = sshra.s32 %s3675_s6, 4  ;;  %s345_s2 = int_to_ptr.vmem [resolvable:$true] %s344_s2  ;;  %s2745_s10 = int_to_ptr.hbm [resolvable:$true] %s2744_s10 }
  0xc1   :  { %s2746_s3 = scalar_lea.hbm %s2745_s10, 64  ;;  %s2748_s5 = scalar_lea.hbm %s3572_s12, 64 }
  0xc2   :  { %p2747_p3 = scmp.ne.s32.totalorder %s2745_s10, %s2746_s3  ;;  %p2749_p4 = scmp.lt.s32.totalorder %s2745_s10, %s3572_s12 }
  0xc3   :  { %p2750_p5 = scmp.lt.s32.totalorder %s2748_s5, %s2746_s3 }
  0xc5   :  { %p2751_p6 = por %p2750_p5, %p2749_p4 }
  0xc7   :  { %p2752_p7 = pnand %p2751_p6, %p2747_p3 }
  0xc9   :  { %2755 = shalt.err (!%p2752_p7)
}
  0xca   :  { %350 = dma.hbm_to_vmem [thread:$0]  %s3675_s6, 1024, %s345_s2, [#allocation33], %s3400_s13, %s3400_s13, %s3401_s22  }
  0xcb   :  { %s393_s11 = sshll.u32 %s3592_s20, 4  ;;  %s3407_s15 = smov [#allocation35]   ;;  %s394_s11 = int_to_ptr.hbm [resolvable:$true] %s393_s11 }
  0xcc   :  { %s370_s19 = sshll.u32 %s3407_s15, 4  ;;  %s2768_s16 = sshra.s32 %s3680_s7, 4  ;;  %s371_s19 = int_to_ptr.vmem [resolvable:$true] %s370_s19  ;;  %s2769_s16 = int_to_ptr.hbm [resolvable:$true] %s2768_s16 }
  0xcd   :  { %s2770_s12 = scalar_lea.hbm %s2769_s16, 64  ;;  %s2772_s18 = scalar_lea.hbm %s3582_s4, 64 }
  0xce   :  { %p2771_p8 = scmp.ne.s32.totalorder %s2769_s16, %s2770_s12  ;;  %p2773_p9 = scmp.lt.s32.totalorder %s2769_s16, %s3582_s4 }
  0xcf   :  { %p2774_p10 = scmp.lt.s32.totalorder %s2772_s18, %s2770_s12 }
  0xd1   :  { %p2775_p11 = por %p2774_p10, %p2773_p9 }
  0xd3   :  { %p2776_p12 = pnand %p2775_p11, %p2771_p8 }
  0xd5   :  { %2779 = shalt.err (!%p2776_p12)
}
  0xd6   :  { %376 = dma.hbm_to_vmem [thread:$0]  %s3680_s7, 1024, %s371_s19, [#allocation36], %s3400_s13, %s3400_s13, %s3401_s22  }
  0xd7   :  { %s3408_s0 = smov [#allocation38]   ;;  %s414_s23 = sshll.u32 %s3602_s24, 4  ;;  %s3698_s23 = int_to_ptr.hbm [resolvable:$true] %s414_s23 }
  0xd8   :  { %s395_s30 = sshll.u32 %s3408_s0, 4  ;;  %s2792_s6 = sshra.s32 %s394_s11, 4  ;;  %s396_s30 = int_to_ptr.vmem [resolvable:$true] %s395_s30  ;;  %s2793_s6 = int_to_ptr.hbm [resolvable:$true] %s2792_s6 }
  0xd9   :  { %s2794_s4 = scalar_lea.hbm %s2793_s6, 1  ;;  %s2796_s28 = scalar_lea.hbm %s3592_s20, 1 }
  0xda   :  { %p2795_p13 = scmp.ne.s32.totalorder %s2793_s6, %s2794_s4  ;;  %p2797_p0 = scmp.lt.s32.totalorder %s2793_s6, %s3592_s20 }
  0xdb   :  { %p2798_p1 = scmp.lt.s32.totalorder %s2796_s28, %s2794_s4 }
  0xdd   :  { %p2799_p2 = por %p2798_p1, %p2797_p0 }
  0xdf   :  { %p2800_p3 = pnand %p2799_p2, %p2795_p13 }
  0xe1   :  { %2803 = shalt.err (!%p2800_p3)
}
  0xe2   :  { %398 = dma.hbm_to_vmem [thread:$0]  %s394_s11, 16, %s396_s30, [#allocation39]  }
  0xe3   :  { %s441_s1 = sshll.u32 %s3612_s29, 4  ;;  %s3409_s27 = smov [#allocation41]   ;;  %s442_s1 = int_to_ptr.hbm [resolvable:$true] %s441_s1 }
  0xe4   :  { %s416_s14 = sshll.u32 %s3409_s27, 4  ;;  %s2816_s21 = sshra.s32 %s3698_s23, 4  ;;  %s417_s14 = int_to_ptr.vmem [resolvable:$true] %s416_s14  ;;  %s2817_s21 = int_to_ptr.hbm [resolvable:$true] %s2816_s21 }
  0xe5   :  { %s2818_s26 = scalar_lea.hbm %s2817_s21, 64  ;;  %s2820_s2 = scalar_lea.hbm %s3602_s24, 64 }
  0xe6   :  { %p2819_p4 = scmp.ne.s32.totalorder %s2817_s21, %s2818_s26  ;;  %p2821_p5 = scmp.lt.s32.totalorder %s2817_s21, %s3602_s24 }
  0xe7   :  { %p2822_p6 = scmp.lt.s32.totalorder %s2820_s2, %s2818_s26 }
  0xe9   :  { %p2823_p7 = por %p2822_p6, %p2821_p5 }
  0xeb   :  { %p2824_p8 = pnand %p2823_p7, %p2819_p4 }
  0xed   :  { %2827 = shalt.err (!%p2824_p8)
}
  0xee   :  { %s3998_s20 = sld [smem:[#allocation72_spill]]  ;;  %s3410_s7 = smov [#allocation44]  }
  0xef   :  { %422 = dma.hbm_to_vmem [thread:$0]  %s3698_s23, 1024, %s417_s14, [#allocation42], %s3400_s13, %s3400_s13, %s3401_s22  }
  0xf0   :  { %s443_s10 = sshll.u32 %s3410_s7, 4  ;;  %s2840_s5 = sshra.s32 %s442_s1, 4  ;;  %s444_s10 = int_to_ptr.vmem [resolvable:$true] %s443_s10  ;;  %s2841_s5 = int_to_ptr.hbm [resolvable:$true] %s2840_s5 }
  0xf1   :  { %s2842_s24 = scalar_lea.hbm %s2841_s5, 1  ;;  %s2844_s11 = scalar_lea.hbm %s3612_s29, 1 }
  0xf2   :  { %p2843_p9 = scmp.ne.s32.totalorder %s2841_s5, %s2842_s24  ;;  %p2845_p10 = scmp.lt.s32.totalorder %s2841_s5, %s3612_s29 }
  0xf3   :  { %p2846_p11 = scmp.lt.s32.totalorder %s2844_s11, %s2842_s24 }
  0xf4   :  { %s109_s3 = sshll.u32 %s3998_s20, 4  ;;  %s3711_s3 = int_to_ptr.hbm [resolvable:$true] %s109_s3 }
  0xf5   :  { %p2847_p12 = por %p2846_p11, %p2845_p10 }
  0xf7   :  { %p2848_p13 = pnand %p2847_p12, %p2843_p9 }
  0xf9   :  { %2851 = shalt.err (!%p2848_p13)
}
  0xfa   :  { %446 = dma.hbm_to_vmem [thread:$0]  %s442_s1, 16, %s444_s10, [#allocation45]  }
  0xfb   :  { %s3999_s15 = sld [smem:[#allocation73_spill]]  ;;  %s3411_s19 = smov [#allocation2]  }
  0xfc   :  { %s111_s16 = sshll.u32 %s3411_s19, 4  ;;  %s2864_s18 = sshra.s32 %s3711_s3, 4  ;;  %s112_s16 = int_to_ptr.vmem [resolvable:$true] %s111_s16  ;;  %s2865_s18 = int_to_ptr.hbm [resolvable:$true] %s2864_s18 }
  0xfd   :  { %s2866_s0 = scalar_lea.hbm %s2865_s18, 16  ;;  %s2868_s30 = scalar_lea.hbm %s3998_s20, 16 }
  0xfe   :  { %p2867_p0 = scmp.ne.s32.totalorder %s2865_s18, %s2866_s0  ;;  %p2869_p1 = scmp.lt.s32.totalorder %s2865_s18, %s3998_s20 }
  0xff   :  { %p2870_p2 = scmp.lt.s32.totalorder %s2868_s30, %s2866_s0 }
 0x101   :  { %s134_s12 = sshll.u32 %s3999_s15, 4  ;;  %p2871_p3 = por %p2870_p2, %p2869_p1  ;;  %s135_s12 = int_to_ptr.hbm [resolvable:$true] %s134_s12 }
 0x103   :  { %p2872_p4 = pnand %p2871_p3, %p2867_p0 }
 0x105   :  { %2875 = shalt.err (!%p2872_p4)
}
 0x106   :  { %s3412_s29 = smov 128   ;;  %s4000_s23 = sld [smem:[#allocation75_spill]] }
 0x107   :  { %s3413_s6 = smov 8   ;;  %s3414_s4 = smov [#allocation7]  }
 0x108   :  { %117 = dma.hbm_to_vmem [thread:$0]  %s3711_s3, 256, %s112_s16, [#allocation3], %s3412_s29, %s3412_s29, %s3413_s6  }
 0x109   :  { %s136_s28 = sshll.u32 %s3414_s4, 4  ;;  %s2888_s27 = sshra.s32 %s135_s12, 4  ;;  %s137_s28 = int_to_ptr.vmem [resolvable:$true] %s136_s28  ;;  %s2889_s27 = int_to_ptr.hbm [resolvable:$true] %s2888_s27 }
 0x10a   :  { %s2890_s14 = scalar_lea.hbm %s2889_s27, 1  ;;  %s2892_s21 = scalar_lea.hbm %s3999_s15, 1 }
 0x10b   :  { %p2891_p5 = scmp.ne.s32.totalorder %s2889_s27, %s2890_s14  ;;  %p2893_p6 = scmp.lt.s32.totalorder %s2889_s27, %s3999_s15 }
 0x10c   :  { %s158_s1 = sshll.u32 %s4000_s23, 4  ;;  %p2894_p7 = scmp.lt.s32.totalorder %s2892_s21, %s2890_s14  ;;  %s159_s1 = int_to_ptr.hbm [resolvable:$true] %s158_s1 }
 0x10e   :  { %p2895_p8 = por %p2894_p7, %p2893_p6 }
 0x110   :  { %p2896_p9 = pnand %p2895_p8, %p2891_p5 }
 0x112   :  { %2899 = shalt.err (!%p2896_p9)
}
 0x113   :  { %139 = dma.hbm_to_vmem [thread:$0]  %s135_s12, 16, %s137_s28, [#allocation6]  }
 0x114   :  { %s4001_s26 = sld [smem:[#allocation79_spill]]  ;;  %s3415_s20 = smov [#allocation10]  }
 0x115   :  { %s160_s7 = sshll.u32 %s3415_s20, 4  ;;  %s2912_s10 = sshra.s32 %s159_s1, 4  ;;  %s161_s7 = int_to_ptr.vmem [resolvable:$true] %s160_s7  ;;  %s2913_s10 = int_to_ptr.hbm [resolvable:$true] %s2912_s10 }
 0x116   :  { %s2914_s3 = scalar_lea.hbm %s2913_s10, 1  ;;  %s2916_s5 = scalar_lea.hbm %s4000_s23, 1 }
 0x117   :  { %p2915_p10 = scmp.ne.s32.totalorder %s2913_s10, %s2914_s3  ;;  %p2917_p11 = scmp.lt.s32.totalorder %s2913_s10, %s4000_s23 }
 0x118   :  { %p2918_p12 = scmp.lt.s32.totalorder %s2916_s5, %s2914_s3 }
 0x11a   :  { %s186_s2 = sshll.u32 %s4001_s26, 4  ;;  %p2919_p13 = por %p2918_p12, %p2917_p11  ;;  %s187_s2 = int_to_ptr.hbm [resolvable:$true] %s186_s2 }
 0x11c   :  { %p2920_p0 = pnand %p2919_p13, %p2915_p10 }
 0x11e   :  { %2923 = shalt.err (!%p2920_p0)
}
 0x11f   :  { %163 = dma.hbm_to_vmem [thread:$0]  %s159_s1, 16, %s161_s7, [#allocation9]  }
 0x120   :  { %s4002_s24 = sld [smem:[#allocation82_spill]]  ;;  %s3416_s11 = smov [#allocation13]  }
 0x121   :  { %s188_s15 = sshll.u32 %s3416_s11, 4  ;;  %s2936_s16 = sshra.s32 %s187_s2, 4  ;;  %s189_s15 = int_to_ptr.vmem [resolvable:$true] %s188_s15  ;;  %s2937_s16 = int_to_ptr.hbm [resolvable:$true] %s2936_s16 }
 0x122   :  { %s2938_s12 = scalar_lea.hbm %s2937_s16, 1  ;;  %s2940_s18 = scalar_lea.hbm %s4001_s26, 1 }
 0x123   :  { %p2939_p1 = scmp.ne.s32.totalorder %s2937_s16, %s2938_s12  ;;  %p2941_p2 = scmp.lt.s32.totalorder %s2937_s16, %s4001_s26 }
 0x124   :  { %p2942_p3 = scmp.lt.s32.totalorder %s2940_s18, %s2938_s12 }
 0x126   :  { %s211_s19 = sshll.u32 %s4002_s24, 4  ;;  %p2943_p4 = por %p2942_p3, %p2941_p2  ;;  %s3730_s19 = int_to_ptr.hbm [resolvable:$true] %s211_s19 }
 0x128   :  { %p2944_p5 = pnand %p2943_p4, %p2939_p1 }
 0x12a   :  { %2947 = shalt.err (!%p2944_p5)
}
 0x12b   :  { %191 = dma.hbm_to_vmem [thread:$0]  %s187_s2, 16, %s189_s15, [#allocation12]  }
 0x12c   :  { %s4003_s0 = sld [smem:[#allocation83_spill]]  ;;  %s3417_s23 = smov [#allocation16]  }
 0x12d   :  { %s213_s4 = sshll.u32 %s3417_s23, 4  ;;  %s2960_s28 = sshra.s32 %s3730_s19, 4  ;;  %s214_s4 = int_to_ptr.vmem [resolvable:$true] %s213_s4  ;;  %s2961_s28 = int_to_ptr.hbm [resolvable:$true] %s2960_s28 }
 0x12e   :  { %s2962_s1 = scalar_lea.hbm %s2961_s28, 64  ;;  %s2964_s27 = scalar_lea.hbm %s4002_s24, 64 }
 0x12f   :  { %p2963_p6 = scmp.ne.s32.totalorder %s2961_s28, %s2962_s1  ;;  %p2965_p7 = scmp.lt.s32.totalorder %s2961_s28, %s4002_s24 }
 0x130   :  { %p2966_p8 = scmp.lt.s32.totalorder %s2964_s27, %s2962_s1 }
 0x132   :  { %s237_s30 = sshll.u32 %s4003_s0, 4  ;;  %p2967_p9 = por %p2966_p8, %p2965_p7  ;;  %s3735_s30 = int_to_ptr.hbm [resolvable:$true] %s237_s30 }
 0x134   :  { %p2968_p10 = pnand %p2967_p9, %p2963_p6 }
 0x136   :  { %2971 = shalt.err (!%p2968_p10)
}
 0x137   :  { %s4004_s14 = sld [smem:[#allocation84_spill]]  ;;  %s3418_s21 = smov [#allocation19]  }
 0x138   :  { %219 = dma.hbm_to_vmem [thread:$0]  %s3730_s19, 1024, %s214_s4, [#allocation15], %s3400_s13, %s3400_s13, %s3401_s22  }
 0x139   :  { %s239_s26 = sshll.u32 %s3418_s21, 4  ;;  %s2984_s20 = sshra.s32 %s3735_s30, 4  ;;  %s240_s26 = int_to_ptr.vmem [resolvable:$true] %s239_s26  ;;  %s2985_s20 = int_to_ptr.hbm [resolvable:$true] %s2984_s20 }
 0x13a   :  { %s2986_s7 = scalar_lea.hbm %s2985_s20, 64  ;;  %s2988_s10 = scalar_lea.hbm %s4003_s0, 64 }
 0x13b   :  { %p2987_p11 = scmp.ne.s32.totalorder %s2985_s20, %s2986_s7  ;;  %p2989_p12 = scmp.lt.s32.totalorder %s2985_s20, %s4003_s0 }
 0x13c   :  { %p2990_p13 = scmp.lt.s32.totalorder %s2988_s10, %s2986_s7 }
 0x13d   :  { %s262_s2 = sshll.u32 %s4004_s14, 4  ;;  %s263_s2 = int_to_ptr.hbm [resolvable:$true] %s262_s2 }
 0x13e   :  { %p2991_p0 = por %p2990_p13, %p2989_p12 }
 0x140   :  { %p2992_p1 = pnand %p2991_p0, %p2987_p11 }
 0x142   :  { %2995 = shalt.err (!%p2992_p1)
}
 0x143   :  { %s4005_s3 = sld [smem:[#allocation85_spill]]  ;;  %s3419_s24 = smov [#allocation22]  }
 0x144   :  { %245 = dma.hbm_to_vmem [thread:$0]  %s3735_s30, 1024, %s240_s26, [#allocation18], %s3400_s13, %s3400_s13, %s3401_s22  }
 0x145   :  { %s264_s11 = sshll.u32 %s3419_s24, 4  ;;  %s3008_s15 = sshra.s32 %s263_s2, 4  ;;  %s265_s11 = int_to_ptr.vmem [resolvable:$true] %s264_s11  ;;  %s3009_s15 = int_to_ptr.hbm [resolvable:$true] %s3008_s15 }
 0x146   :  { %s3010_s19 = scalar_lea.hbm %s3009_s15, 1  ;;  %s3012_s16 = scalar_lea.hbm %s4004_s14, 1 }
 0x147   :  { %p3011_p2 = scmp.ne.s32.totalorder %s3009_s15, %s3010_s19  ;;  %p3013_p3 = scmp.lt.s32.totalorder %s3009_s15, %s4004_s14 }
 0x148   :  { %p3014_p4 = scmp.lt.s32.totalorder %s3012_s16, %s3010_s19 }
 0x149   :  { %s283_s5 = sshll.u32 %s4005_s3, 4  ;;  %s3753_s5 = int_to_ptr.hbm [resolvable:$true] %s283_s5 }
 0x14a   :  { %p3015_p5 = por %p3014_p4, %p3013_p3 }
 0x14c   :  { %p3016_p6 = pnand %p3015_p5, %p3011_p2 }
 0x14e   :  { %3019 = shalt.err (!%p3016_p6)
}
 0x14f   :  { %267 = dma.hbm_to_vmem [thread:$0]  %s263_s2, 16, %s265_s11, [#allocation21]  }
 0x150   :  { %s4006_s12 = sld [smem:[#allocation86_spill]]  ;;  %s3420_s18 = smov [#allocation25]  }
 0x151   :  { %s285_s0 = sshll.u32 %s3420_s18, 4  ;;  %s3032_s23 = sshra.s32 %s3753_s5, 4  ;;  %s286_s0 = int_to_ptr.vmem [resolvable:$true] %s285_s0  ;;  %s3033_s23 = int_to_ptr.hbm [resolvable:$true] %s3032_s23 }
 0x152   :  { %s3034_s4 = scalar_lea.hbm %s3033_s23, 64  ;;  %s3036_s28 = scalar_lea.hbm %s4005_s3, 64 }
 0x153   :  { %p3035_p7 = scmp.ne.s32.totalorder %s3033_s23, %s3034_s4  ;;  %p3037_p8 = scmp.lt.s32.totalorder %s3033_s23, %s4005_s3 }
 0x154   :  { %p3038_p9 = scmp.lt.s32.totalorder %s3036_s28, %s3034_s4 }
 0x156   :  { %s310_s30 = sshll.u32 %s4006_s12, 4  ;;  %p3039_p10 = por %p3038_p9, %p3037_p8  ;;  %s311_s30 = int_to_ptr.hbm [resolvable:$true] %s310_s30 }
 0x158   :  { %p3040_p11 = pnand %p3039_p10, %p3035_p7 }
 0x15a   :  { %3043 = shalt.err (!%p3040_p11)
}
 0x15b   :  { %s4007_s1 = sld [smem:[#allocation87_spill]]  ;;  %s3421_s14 = smov [#allocation28]  }
 0x15c   :  { %291 = dma.hbm_to_vmem [thread:$0]  %s3753_s5, 1024, %s286_s0, [#allocation24], %s3400_s13, %s3400_s13, %s3401_s22  }
 0x15d   :  { %s312_s21 = sshll.u32 %s3421_s14, 4  ;;  %s3056_s26 = sshra.s32 %s311_s30, 4  ;;  %s313_s21 = int_to_ptr.vmem [resolvable:$true] %s312_s21  ;;  %s3057_s26 = int_to_ptr.hbm [resolvable:$true] %s3056_s26 }
 0x15e   :  { %s3058_s2 = scalar_lea.hbm %s3057_s26, 1  ;;  %s3060_s20 = scalar_lea.hbm %s4006_s12, 1 }
 0x15f   :  { %p3059_p12 = scmp.ne.s32.totalorder %s3057_s26, %s3058_s2  ;;  %p3061_p13 = scmp.lt.s32.totalorder %s3057_s26, %s4006_s12 }
 0x160   :  { %p3062_p0 = scmp.lt.s32.totalorder %s3060_s20, %s3058_s2 }
 0x161   :  { %s332_s27 = sshll.u32 %s4007_s1, 4  ;;  %s333_s27 = int_to_ptr.hbm [resolvable:$true] %s332_s27 }
 0x162   :  { %p3063_p1 = por %p3062_p0, %p3061_p13 }
 0x164   :  { %p3064_p2 = pnand %p3063_p1, %p3059_p12 }
 0x166   :  { %3067 = shalt.err (!%p3064_p2)
}
 0x167   :  { %315 = dma.hbm_to_vmem [thread:$0]  %s311_s30, 16, %s313_s21, [#allocation27]  }
 0x168   :  { %s4008_s7 = sld [smem:[#allocation88_spill]]  ;;  %s3422_s10 = smov [#allocation31]  }
 0x169   :  { %s334_s3 = sshll.u32 %s3422_s10, 4  ;;  %s3080_s24 = sshra.s32 %s333_s27, 4  ;;  %s335_s3 = int_to_ptr.vmem [resolvable:$true] %s334_s3  ;;  %s3081_s24 = int_to_ptr.hbm [resolvable:$true] %s3080_s24 }
 0x16a   :  { %s3082_s11 = scalar_lea.hbm %s3081_s24, 1  ;;  %s3084_s15 = scalar_lea.hbm %s4007_s1, 1 }
 0x16b   :  { %p3083_p3 = scmp.ne.s32.totalorder %s3081_s24, %s3082_s11  ;;  %p3085_p4 = scmp.lt.s32.totalorder %s3081_s24, %s4007_s1 }
 0x16c   :  { %p3086_p5 = scmp.lt.s32.totalorder %s3084_s15, %s3082_s11 }
 0x16e   :  { %s355_s5 = sshll.u32 %s4008_s7, 4  ;;  %p3087_p6 = por %p3086_p5, %p3085_p4  ;;  %s3769_s5 = int_to_ptr.hbm [resolvable:$true] %s355_s5 }
 0x170   :  { %p3088_p7 = pnand %p3087_p6, %p3083_p3 }
 0x172   :  { %3091 = shalt.err (!%p3088_p7)
}
 0x173   :  { %337 = dma.hbm_to_vmem [thread:$0]  %s333_s27, 16, %s335_s3, [#allocation30]  }
 0x174   :  { %s4009_s19 = sld [smem:[#allocation89_spill]]  ;;  %s3423_s12 = smov [#allocation34]  }
 0x175   :  { %s357_s18 = sshll.u32 %s3423_s12, 4  ;;  %s3104_s0 = sshra.s32 %s3769_s5, 4  ;;  %s358_s18 = int_to_ptr.vmem [resolvable:$true] %s357_s18  ;;  %s3105_s0 = int_to_ptr.hbm [resolvable:$true] %s3104_s0 }
 0x176   :  { %s3106_s30 = scalar_lea.hbm %s3105_s0, 64  ;;  %s3108_s23 = scalar_lea.hbm %s4008_s7, 64 }
 0x177   :  { %p3107_p8 = scmp.ne.s32.totalorder %s3105_s0, %s3106_s30  ;;  %p3109_p9 = scmp.lt.s32.totalorder %s3105_s0, %s4008_s7 }
 0x178   :  { %p3110_p10 = scmp.lt.s32.totalorder %s3108_s23, %s3106_s30 }
 0x17a   :  { %s382_s16 = sshll.u32 %s4009_s19, 4  ;;  %p3111_p11 = por %p3110_p10, %p3109_p9  ;;  %s383_s16 = int_to_ptr.hbm [resolvable:$true] %s382_s16 }
 0x17c   :  { %p3112_p12 = pnand %p3111_p11, %p3107_p8 }
 0x17e   :  { %3115 = shalt.err (!%p3112_p12)
}
 0x17f   :  { %s4010_s4 = sld [smem:[#allocation90_spill]]  ;;  %s3424_s28 = smov [#allocation37]  }
 0x180   :  { %363 = dma.hbm_to_vmem [thread:$0]  %s3769_s5, 1024, %s358_s18, [#allocation33], %s3400_s13, %s3400_s13, %s3401_s22  }
 0x181   :  { %s384_s1 = sshll.u32 %s3424_s28, 4  ;;  %s3128_s14 = sshra.s32 %s383_s16, 4  ;;  %s385_s1 = int_to_ptr.vmem [resolvable:$true] %s384_s1  ;;  %s3129_s14 = int_to_ptr.hbm [resolvable:$true] %s3128_s14 }
 0x182   :  { %s3130_s21 = scalar_lea.hbm %s3129_s14, 1  ;;  %s3132_s26 = scalar_lea.hbm %s4009_s19, 1 }
 0x183   :  { %p3131_p13 = scmp.ne.s32.totalorder %s3129_s14, %s3130_s21  ;;  %p3133_p0 = scmp.lt.s32.totalorder %s3129_s14, %s4009_s19 }
 0x184   :  { %p3134_p1 = scmp.lt.s32.totalorder %s3132_s26, %s3130_s21 }
 0x185   :  { %s404_s27 = sshll.u32 %s4010_s4, 4  ;;  %s405_s27 = int_to_ptr.hbm [resolvable:$true] %s404_s27 }
 0x186   :  { %p3135_p2 = por %p3134_p1, %p3133_p0 }
 0x188   :  { %p3136_p3 = pnand %p3135_p2, %p3131_p13 }
 0x18a   :  { %3139 = shalt.err (!%p3136_p3)
}
 0x18b   :  { %387 = dma.hbm_to_vmem [thread:$0]  %s383_s16, 16, %s385_s1, [#allocation36]  }
 0x18c   :  { %s4011_s2 = sld [smem:[#allocation91_spill]]  ;;  %s3425_s7 = smov [#allocation40]  }
 0x18d   :  { %s406_s10 = sshll.u32 %s3425_s7, 4  ;;  %s3152_s3 = sshra.s32 %s405_s27, 4  ;;  %s407_s10 = int_to_ptr.vmem [resolvable:$true] %s406_s10  ;;  %s3153_s3 = int_to_ptr.hbm [resolvable:$true] %s3152_s3 }
 0x18e   :  { %s3154_s5 = scalar_lea.hbm %s3153_s3, 1  ;;  %s3156_s24 = scalar_lea.hbm %s4010_s4, 1 }
 0x18f   :  { %p3155_p4 = scmp.ne.s32.totalorder %s3153_s3, %s3154_s5  ;;  %p3157_p5 = scmp.lt.s32.totalorder %s3153_s3, %s4010_s4 }
 0x190   :  { %p3158_p6 = scmp.lt.s32.totalorder %s3156_s24, %s3154_s5 }
 0x192   :  { %s427_s20 = sshll.u32 %s4011_s2, 4  ;;  %p3159_p7 = por %p3158_p6, %p3157_p5  ;;  %s3785_s20 = int_to_ptr.hbm [resolvable:$true] %s427_s20 }
 0x194   :  { %p3160_p8 = pnand %p3159_p7, %p3155_p4 }
 0x196   :  { %3163 = shalt.err (!%p3160_p8)
}
 0x197   :  { %409 = dma.hbm_to_vmem [thread:$0]  %s405_s27, 16, %s407_s10, [#allocation39]  }
 0x198   :  { %s4012_s11 = sld [smem:[#allocation92_spill]]  ;;  %s3426_s15 = smov [#allocation43]  }
 0x199   :  { %s429_s19 = sshll.u32 %s3426_s15, 4  ;;  %s3176_s12 = sshra.s32 %s3785_s20, 4  ;;  %s430_s19 = int_to_ptr.vmem [resolvable:$true] %s429_s19  ;;  %s3177_s12 = int_to_ptr.hbm [resolvable:$true] %s3176_s12 }
 0x19a   :  { %s3178_s18 = scalar_lea.hbm %s3177_s12, 64  ;;  %s3180_s0 = scalar_lea.hbm %s4011_s2, 64 }
 0x19b   :  { %p3179_p9 = scmp.ne.s32.totalorder %s3177_s12, %s3178_s18  ;;  %p3181_p10 = scmp.lt.s32.totalorder %s3177_s12, %s4011_s2 }
 0x19c   :  { %p3182_p11 = scmp.lt.s32.totalorder %s3180_s0, %s3178_s18 }
 0x19e   :  { %s452_s16 = sshll.u32 %s4012_s11, 4  ;;  %p3183_p12 = por %p3182_p11, %p3181_p10  ;;  %s453_s16 = int_to_ptr.hbm [resolvable:$true] %s452_s16 }
 0x1a0   :  { %p3184_p13 = pnand %p3183_p12, %p3179_p9 }
 0x1a2   :  { %3187 = shalt.err (!%p3184_p13)
}
 0x1a3   :  { %435 = dma.hbm_to_vmem [thread:$0]  %s3785_s20, 1024, %s430_s19, [#allocation42], %s3400_s13, %s3400_s13, %s3401_s22  }
 0x1a4   :  { %s463_s30 = sshll.u32 %s3622_s17, 4  ;;  %s3427_s23 = smov [#allocation46]   ;;  %s464_s30 = int_to_ptr.hbm [resolvable:$true] %s463_s30 }
 0x1a5   :  { %s454_s4 = sshll.u32 %s3427_s23, 4  ;;  %s3200_s28 = sshra.s32 %s453_s16, 4  ;;  %s455_s4 = int_to_ptr.vmem [resolvable:$true] %s454_s4  ;;  %s3201_s28 = int_to_ptr.hbm [resolvable:$true] %s3200_s28 }
 0x1a6   :  { %s3202_s1 = scalar_lea.hbm %s3201_s28, 1  ;;  %s3204_s27 = scalar_lea.hbm %s4012_s11, 1 }
 0x1a7   :  { %p3203_p0 = scmp.ne.s32.totalorder %s3201_s28, %s3202_s1  ;;  %p3205_p1 = scmp.lt.s32.totalorder %s3201_s28, %s4012_s11 }
 0x1a8   :  { %p3206_p2 = scmp.lt.s32.totalorder %s3204_s27, %s3202_s1 }
 0x1aa   :  { %p3207_p3 = por %p3206_p2, %p3205_p1 }
 0x1ac   :  { %p3208_p4 = pnand %p3207_p3, %p3203_p0 }
 0x1ae   :  { %3211 = shalt.err (!%p3208_p4)
}
 0x1af   :  { %457 = dma.hbm_to_vmem [thread:$0]  %s453_s16, 16, %s455_s4, [#allocation45]  }
 0x1b0   :  { %s3428_s14 = smov [#allocation47]   ;;  %s3224_s22 = sshra.s32 %s464_s30, 4  ;;  %s3225_s22 = int_to_ptr.hbm [resolvable:$true] %s3224_s22 }
 0x1b1   :  { %s465_s13 = sshll.u32 %s3428_s14, 4  ;;  %s3226_s21 = scalar_lea.hbm %s3225_s22, 1  ;;  %s466_s13 = int_to_ptr.vmem [resolvable:$true] %s465_s13 }
 0x1b2   :  { %p3227_p5 = scmp.ne.s32.totalorder %s3225_s22, %s3226_s21  ;;  %s3228_s26 = scalar_lea.hbm %s3622_s17, 1 }
 0x1b3   :  { %p3229_p6 = scmp.lt.s32.totalorder %s3225_s22, %s3622_s17  ;;  %p3230_p7 = scmp.lt.s32.totalorder %s3228_s26, %s3226_s21 }
 0x1b5   :  { %p3231_p8 = por %p3230_p7, %p3229_p6 }
 0x1b7   :  { %p3232_p9 = pnand %p3231_p8, %p3227_p5 }
 0x1b9   :  { %3235 = shalt.err (!%p3232_p9)
}
 0x1ba   :  { %468 = dma.hbm_to_vmem [thread:$0]  %s464_s30, 16, %s466_s13, [#allocation48]  }
 0x1bb   :  { %3320 = dma.done.wait [#allocation3], 256  }
 0x1bc   :  { %3321 = vsyncadd [#allocation3], 4294967040 }
 0x1bd   :  { %3322 = dma.done.wait [#allocation6], 32  }
 0x1be   :  { %3323 = vsyncadd [#allocation6], 4294967264 }
 0x1bf   :  { %3324 = dma.done.wait [#allocation9], 32  }
 0x1c0   :  { %3325 = vsyncadd [#allocation9], 4294967264 }
 0x1c1   :  { %3326 = dma.done.wait [#allocation12], 32  }
 0x1c2   :  { %3327 = vsyncadd [#allocation12], 4294967264 }
 0x1c3   :  { %3328 = dma.done.wait [#allocation15], 1040  }
 0x1c4   :  { %3329 = vsyncadd [#allocation15], 4294966256 }
 0x1c5   :  { %3330 = dma.done.wait [#allocation18], 2048  }
 0x1c6   :  { %3331 = vsyncadd [#allocation18], 4294965248 }
 0x1c7   :  { %3332 = dma.done.wait [#allocation21], 32  }
 0x1c8   :  { %3333 = vsyncadd [#allocation21], 4294967264 }
 0x1c9   :  { %3334 = dma.done.wait [#allocation24], 1040  }
 0x1ca   :  { %3335 = vsyncadd [#allocation24], 4294966256 }
 0x1cb   :  { %3336 = dma.done.wait [#allocation27], 1040  }
 0x1cc   :  { %3337 = vsyncadd [#allocation27], 4294966256 }
 0x1cd   :  { %3338 = dma.done.wait [#allocation30], 32  }
 0x1ce   :  { %3339 = vsyncadd [#allocation30], 4294967264 }
 0x1cf   :  { %3340 = dma.done.wait [#allocation33], 2048  }
 0x1d0   :  { %3341 = vsyncadd [#allocation33], 4294965248 }
 0x1d1   :  { %3342 = dma.done.wait [#allocation36], 1040  }
 0x1d2   :  { %3343 = vsyncadd [#allocation36], 4294966256 }
 0x1d3   :  { %3344 = dma.done.wait [#allocation39], 32  }
 0x1d4   :  { %3345 = vsyncadd [#allocation39], 4294967264 }
 0x1d5   :  { %3346 = dma.done.wait [#allocation42], 2048  }
 0x1d6   :  { %3347 = vsyncadd [#allocation42], 4294965248 }
 0x1d7   :  { %3348 = dma.done.wait [#allocation45], 32  }
 0x1d8   :  { %3349 = vsyncadd [#allocation45], 4294967264 }
 0x1d9   :  { %3350 = dma.done.wait [#allocation48], 16  }
 0x1da   :  { %3351 = vsyncadd [#allocation48], 4294967280  ;;  %s4013_s17 = sld [smem:[#allocation71_spill]]  ;;  %v592_v0 = vld [vmem:[#allocation2 + $0x8] sm:$0xff]  ;;  %v591_v1 = vld [vmem:[#allocation2] sm:$0xff]  ;;  %vm597_vm0 = vcmask 130048  }
 0x1db   :  { %s4014_s2 = sld [smem:[#allocation74_spill]]  ;;  %618 = vmatpush.msra.mxu3 %v592_v0  ;;  %v3429_v4 = vmov 8.0   ;;  %v2339_v9 = vld [vmem:[#allocation19 + $0x38] sm:$0xff]  ;;  %v2338_v16 = vld [vmem:[#allocation19 + $0x30] sm:$0xff]  ;;  %v2337_v23 = vld [vmem:[#allocation19 + $0x28] sm:$0xff]  ;;  %v3430_v36 = vmov 16.0  }
 0x1dc   :  { %2510 = vrcp.f32 %v3429_v4  ;;  %872 = vmatpush.bf16.msra.mxu2 %v2339_v9  ;;  %v2347_v29 = vld [vmem:[#allocation16 + $0x38] sm:$0xff]  ;;  %v2336_v30 = vld [vmem:[#allocation19 + $0x20] sm:$0xff]  ;;  %v2346_v35 = vld [vmem:[#allocation16 + $0x30] sm:$0xff]  ;;  %s4015_s20 = sld [smem:[#allocation77_spill]]  ;;  %vm739_vm6 = vcmask 1042432   ;;  %vm735_vm7 = vcmask 23552  }
 0x1dd   :  { %619 = vmatpush.msra.mxu3 %v591_v1  ;;  %v2355_v33 = vld [vmem:[#allocation17 + $0x38] sm:$0xff]  ;;  %2512 = vrcp.f32 %v3430_v36  ;;  %v2354_v39 = vld [vmem:[#allocation17 + $0x30] sm:$0xff]  ;;  %v2345_v41 = vld [vmem:[#allocation16 + $0x28] sm:$0xff]  ;;  %s4016_s7 = sld [smem:[#allocation76_spill]]  ;;  %vm1044_vm11 = vcmask 195584   ;;  %s3431_s24 = smov [#allocation50]  }
 0x1de   :  { %1028 = vmatpush.bf16.msra.mxu1 %v2355_v33  ;;  %v2335_v37 = vld [vmem:[#allocation19 + $0x18] sm:$0xff]  ;;  %v2334_v42 = vld [vmem:[#allocation19 + $0x10] sm:$0xff]  ;;  %v2353_v43 = vld [vmem:[#allocation17 + $0x28] sm:$0xff]  ;;  %s4017_s10 = sld [smem:[#allocation80_spill]]  ;;  %s1916_s11 = sshll.u32 %s3431_s24, 4  ;;  %s1917_s11 = int_to_ptr.vmem [resolvable:$true] %s1916_s11 }
 0x1df   :  { %951 = vmatpush.bf16.msrb.mxu3 %v2347_v29  ;;  %v2490_v45 = vld [vmem:[#allocation5] ss:$0 sm:$0xff]  ;;  %v2344_v46 = vld [vmem:[#allocation16 + $0x20] sm:$0xff]  ;;  %v2333_v48 = vld [vmem:[#allocation19 + $0x8] sm:$0xff]  ;;  %s4018_s3 = sld [smem:[#allocation81_spill]]  ;;  %s1918_s15 = sshll.u32 %s3632_s9, 4  ;;  %s1919_s15 = int_to_ptr.hbm [resolvable:$true] %s1918_s15 }
 0x1e0   :  { %v589_v2 = vld [vmem:[%s4013_s17] sm:$0xff]  ;;  %v590_v3 = vld [vmem:[%s4013_s17 + $0x8] sm:$0xff]  ;;  %873 = vmatpush.bf16.msra.mxu2 %v2338_v16  ;;  %v2343_v54 = vld [vmem:[#allocation16 + $0x18] sm:$0xff]  ;;  %s4019_s5 = sld [smem:[#allocation78_spill]]  ;;  %s3432_s19 = smov [#allocation52]  }
 0x1e1   :  { %2002 = vmatmul.msk.f32.vlgmr.msra.gmra.mxu3 %vm597_vm0, %v589_v2  ;;  %v3807_v5 = vld [vmem:[%s4014_s2] sm:$0xff]  ;;  %v2351_v59 = vld [vmem:[#allocation17 + $0x18] sm:$0xff]  ;;  %v2342_v1 = vld [vmem:[#allocation16 + $0x10] sm:$0xff]  ;;  %s3941_s16 = sshll.u32 %s3432_s19, 4  ;;  %s1929_s12 = sshll.u32 %s3637_s25, 4  ;;  %s1928_s16 = int_to_ptr.vmem [resolvable:$true] %s3941_s16  ;;  %s1930_s12 = int_to_ptr.hbm [resolvable:$true] %s1929_s12 }
 0x1e2   :  { %v684_v6 = vrot.slane %v3807_v5, 4  ;;  %v698_v7 = vmul.f32 %v3807_v5, %v3807_v5  ;;  %v2511_v8 = vpop.eup %2510  ;;  %1029 = vmatpush.bf16.msra.mxu1 %v2354_v39  ;;  %v2352_v50 = vld [vmem:[#allocation17 + $0x20] sm:$0xff]  ;;  %s3260_s18 = sshra.s32 %s1919_s15, 4  ;;  %s3264_s30 = scalar_lea.hbm %s3632_s9, 8  ;;  %s3261_s18 = int_to_ptr.hbm [resolvable:$true] %s3260_s18 }
 0x1e3   :  { %v691_v12 = vmul.f32 8.0, %v2511_v8  ;;  %vm695_vm1 = vweird.f32 %v2511_v8  ;;  %952 = vmatpush.bf16.msrb.mxu3 %v2346_v35  ;;  %v3821_v44 = vpop.eup %2512  ;;  %v2332_v57 = vld [vmem:[#allocation19] sm:$0xff]  ;;  %s3262_s0 = scalar_lea.hbm %s3261_s18, 8  ;;  %p3265_p11 = scmp.lt.s32.totalorder %s3261_s18, %s3632_s9 }
 0x1e4   :  { %v685_v10 = vadd.f32 %v684_v6, %v3807_v5  ;;  %v699_v11 = vrot.slane %v698_v7, 4  ;;  %874 = vmatpush.bf16.msra.mxu2 %v2337_v23  ;;  %v637_v49 = vmul.f32 16.0, %v3821_v44  ;;  %v2371_v60 = vld [vmem:[#allocation25 + $0x38] sm:$0xff]  ;;  %vm641_vm5 = vweird.f32 %v3821_v44  ;;  %p3263_p10 = scmp.ne.s32.totalorder %s3261_s18, %s3262_s0  ;;  %p3266_p12 = scmp.lt.s32.totalorder %s3264_s30, %s3262_s0 }
 0x1e5   :  { %v692_v15 = vsub.f32 1.0, %v691_v12 }
 0x1e6   :  { %v686_v13 = vrot.slane %v685_v10, 2  ;;  %v700_v14 = vadd.f32 %v699_v11, %v698_v7  ;;  %1030 = vmatpush.bf16.msra.mxu1 %v2353_v43  ;;  %v638_v58 = vsub.f32 1.0, %v637_v49  ;;  %v2350_v7 = vld [vmem:[#allocation17 + $0x10] sm:$0xff]  ;;  %v730_v49 = vld [vmem:[%s4015_s20] sm:$0x7]  ;;  %p3267_p13 = por %p3266_p12, %p3265_p11 }
 0x1e7   :  { %v693_v19 = vmul.f32 %v2511_v8, %v692_v15  ;;  %953 = vmatpush.bf16.msrb.mxu3 %v2345_v41  ;;  %v2366_v41 = vld [vmem:[#allocation25 + $0x10] sm:$0xff]  ;;  %2004 = vmatpush.msk.msra.mxu0 %vm739_vm6, %v730_v49 }
 0x1e8   :  { %v687_v17 = vadd.f32 %v686_v13, %v685_v10  ;;  %v701_v18 = vrot.slane %v700_v14, 2  ;;  %875 = vmatpush.bf16.msra.mxu2 %v2336_v30  ;;  %v639_v6 = vmul.f32 %v3821_v44, %v638_v58  ;;  %v2341_v13 = vld [vmem:[#allocation16 + $0x8] sm:$0xff]  ;;  %v2491_v58 = vld [vmem:[#allocation7] ss:$0 sm:$0xff]  ;;  %p3268_p0 = pnand %p3267_p13, %p3263_p10 }
 0x1e9   :  { %2003 = vmatmul.msk.f32.gmra.mxu3 %vm597_vm0, %v590_v3  ;;  %v694_v22 = vadd.f32 %v2511_v8, %v693_v19 }
 0x1ea   :  { %v688_v20 = vrot.slane %v687_v17, 1  ;;  %v702_v21 = vadd.f32 %v701_v18, %v700_v14  ;;  %1031 = vmatpush.bf16.msra.mxu1 %v2352_v50  ;;  %v2493_v18 = vld [vmem:[#allocation10] ss:$0 sm:$0xff]  ;;  %v640_v19 = vadd.f32 %v3821_v44, %v639_v6  ;;  %v729_v50 = vld [vmem:[%s4016_s7] sm:$0xff] }
 0x1eb   :  { %v3813_v26 = vsel %vm695_vm1, %v2511_v8, %v694_v22  ;;  %954 = vmatpush.bf16.msrb.mxu3 %v2344_v46  ;;  %v2370_v8 = vld [vmem:[#allocation25 + $0x30] sm:$0xff]  ;;  %2005 = vmatmul.msk.f32.vlgmr.msra.gmra.mxu0 %vm735_vm7, %v729_v50 }
 0x1ec   :  { %v689_v24 = vadd.f32 %v688_v20, %v687_v17  ;;  %v703_v25 = vrot.slane %v702_v21, 1  ;;  %876 = vmatpush.bf16.msra.mxu2 %v2335_v37  ;;  %v2349_v20 = vld [vmem:[#allocation17 + $0x8] sm:$0xff] }
 0x1ee   :  { %v3816_v27 = vmul.f32 %v3813_v26, %v689_v24  ;;  %v704_v28 = vadd.f32 %v703_v25, %v702_v21  ;;  %1032 = vmatpush.bf16.msra.mxu1 %v2351_v59  ;;  %v2369_v21 = vld [vmem:[#allocation25 + $0x28] sm:$0xff]  ;;  %v2340_v24 = vld [vmem:[#allocation16] sm:$0xff] }
 0x1ef   :  { %955 = vmatpush.bf16.msrb.mxu3 %v2343_v54  ;;  %v2348_v25 = vld [vmem:[#allocation17] sm:$0xff] }
 0x1f0   :  { %v705_v31 = vmul.f32 %v704_v28, %v3813_v26  ;;  %v706_v32 = vmul.f32 %v3816_v27, %v3816_v27  ;;  %877 = vmatpush.bf16.msra.mxu2 %v2334_v42  ;;  %v708_v12 = vsub.f32 %v3807_v5, %v3816_v27  ;;  %v2368_v27 = vld [vmem:[#allocation25 + $0x20] sm:$0xff]  ;;  %v2494_v28 = vld [vmem:[#allocation11] ss:$0 sm:$0xff] }
 0x1f2   :  { %v707_v34 = vsub.f32 %v705_v31, %v706_v32  ;;  %1033 = vmatpush.bf16.msra.mxu1 %v2350_v7  ;;  %v3840_v31 = vsel %vm641_vm5, %v3821_v44, %v640_v19  ;;  %v2365_v44 = vld [vmem:[#allocation25 + $0x8] sm:$0xff]  ;;  %v3866_v19 = vld [vmem:[%s4018_s3] sm:$0xff] }
 0x1f3   :  { %956 = vmatpush.bf16.msrb.mxu3 %v2342_v1 }
 0x1f4   :  { %v709_v38 = vadd.f32 1e-05, %v707_v34  ;;  %878 = vmatpush.bf16.msra.mxu2 %v2333_v48 }
 0x1f6   :  { %2514 = vrsqrt.f32 %v709_v38  ;;  %vm716_vm2 = vweird.f32 %v709_v38  ;;  %1034 = vmatpush.bf16.msra.mxu1 %v2349_v20  ;;  %v2496_v20 = vld [vmem:[%s4019_s5] ss:$0 sm:$0xff] }
 0x1f7   :  { %957 = vmatpush.bf16.msrb.mxu3 %v2341_v13  ;;  %v2361_v13 = vld [vmem:[#allocation26 + $0x28] sm:$0xff] }
 0x1f8   :  { %879 = vmatpush.bf16.msra.mxu2 %v2332_v57 }
 0x1fa   :  { %1035 = vmatpush.bf16.msra.mxu1 %v2348_v25 }
 0x1fb   :  { %958 = vmatpush.bf16.msrb.mxu3 %v2340_v24  ;;  %v2356_v24 = vld [vmem:[#allocation26] sm:$0xff] }
 0x1fc   :  { %v2515_v47 = vpop.eup %2514  ;;  %1274 = vmatpush.bf16.msrb.mxu2 %v2371_v60 }
 0x1fd   :  { %v711_v51 = vmul.f32 %v2515_v47, %v709_v38  ;;  %vm717_vm3 = vweird.f32 %v2515_v47  ;;  %v2367_v38 = vld [vmem:[#allocation25 + $0x18] sm:$0xff] }
 0x1fe   :  { %vm718_vm4 = vmor %vm716_vm2, %vm717_vm3 }
 0x1ff   :  { %v712_v55 = vmul.f32 %v2515_v47, %v711_v51 }
 0x200   :  { %1275 = vmatpush.bf16.msrb.mxu2 %v2370_v8  ;;  %v3854_v8 = vld [vmem:[%s4017_s10] sm:$0xff] }
 0x201   :  { %v713_v61 = vmul.f32 0.5, %v712_v55 }
 0x203   :  { %v714_v2 = vsub.f32 1.5, %v713_v61 }
 0x204   :  { %1276 = vmatpush.bf16.msrb.mxu2 %v2369_v21 }
 0x205   :  { %v715_v9 = vmul.f32 %v2515_v47, %v714_v2 }
 0x207   :  { %v719_v14 = vsel %vm718_vm4, %v2515_v47, %v715_v9  ;;  %v2363_v9 = vld [vmem:[#allocation26 + $0x38] sm:$0xff] }
 0x208   :  { %v720_v17 = vmul.f32 %v719_v14, %v708_v12  ;;  %1277 = vmatpush.bf16.msrb.mxu2 %v2368_v27  ;;  %v3861_v12 = vld [vmem:[%s4017_s10 + $0x8] sm:$0xff] }
 0x20a   :  { %v724_v5 = vmul.f32 %v2493_v18, %v720_v17  ;;  %v2358_v18 = vld [vmem:[#allocation26 + $0x10] sm:$0xff] }
 0x20c   :  { %v728_v32 = vadd.f32 %v2494_v28, %v724_v5  ;;  %1278 = vmatpush.bf16.msrb.mxu2 %v2367_v38 }
 0x20e   :  { %v3842_v35 = vpack.c.bf16 %v728_v32, %v728_v32 }
 0x210   :  { %959 = vmatmul.bf16.vlgmr.msrb.gmra.mxu3 %v3842_v35  ;;  %1279 = vmatpush.bf16.msrb.mxu2 %v2366_v41 }
 0x214   :  { %1280 = vmatpush.bf16.msrb.mxu2 %v2365_v44 }
 0x264   :  { %v621_v40 = vpop.f32.mrf.mxu3 }
 0x265   :  { %v3824_v52 = vadd.f32 %v2490_v45, %v621_v40 }
 0x267   :  { %v644_v62 = vmul.f32 %v3824_v52, %v3824_v52 }
 0x268   :  { %v760_v21 = vpop.f32.mrf.mxu0 }
 0x26c   :  { %v624_v53 = vpop.f32.mrf.mxu3 }
 0x26d   :  { %v3826_v56 = vadd.f32 %v2490_v45, %v624_v53  ;;  %v2364_v45 = vld [vmem:[#allocation25] sm:$0xff] }
 0x26e   :  { %1281 = vmatpush.bf16.msrb.mxu2 %v2364_v45 }
 0x26f   :  { %v629_v63 = vadd.f32 %v3826_v56, %v3824_v52  ;;  %v645_v0 = vmul.f32 %v3826_v56, %v3826_v56 }
 0x271   :  { %v630_v3 = vrot.slane %v629_v63, 4  ;;  %v646_v4 = vadd.f32 %v645_v0, %v644_v62  ;;  %v2492_v62 = vld [vmem:[#allocation8] ss:$0 sm:$0xff] }
 0x273   :  { %v631_v10 = vadd.f32 %v630_v3, %v629_v63  ;;  %v647_v11 = vrot.slane %v646_v4, 4 }
 0x275   :  { %v632_v15 = vrot.slane %v631_v10, 2  ;;  %v648_v16 = vadd.f32 %v647_v11, %v646_v4  ;;  %v2362_v11 = vld [vmem:[#allocation26 + $0x30] sm:$0xff] }
 0x277   :  { %v633_v22 = vadd.f32 %v632_v15, %v631_v10  ;;  %v649_v23 = vrot.slane %v648_v16, 2  ;;  %v2360_v15 = vld [vmem:[#allocation26 + $0x20] sm:$0xff] }
 0x279   :  { %v634_v29 = vrot.slane %v633_v22, 1  ;;  %v650_v30 = vadd.f32 %v649_v23, %v648_v16  ;;  %v2359_v16 = vld [vmem:[#allocation26 + $0x18] sm:$0xff]  ;;  %v761_v23 = vadd.f32 %v2496_v20, %v760_v21 }
 0x27a   :  { %v2374_v21 = vld [vmem:[#allocation35 + $0x10] sm:$0xff] }
 0x27b   :  { %v635_v33 = vadd.f32 %v634_v29, %v633_v22  ;;  %v651_v34 = vrot.slane %v650_v30, 1  ;;  %v2357_v22 = vld [vmem:[#allocation26 + $0x8] sm:$0xff]  ;;  %v765_v5 = vrot.slane %v761_v23, 4  ;;  %v772_v25 = vmul.f32 %v761_v23, %v761_v23 }
 0x27d   :  { %v643_v36 = vmul.f32 %v3840_v31, %v635_v33  ;;  %v652_v37 = vadd.f32 %v651_v34, %v650_v30  ;;  %v766_v27 = vadd.f32 %v765_v5, %v761_v23  ;;  %v773_v28 = vrot.slane %v772_v25, 4 }
 0x27f   :  { %v653_v39 = vmul.f32 %v652_v37, %v3840_v31  ;;  %v654_v40 = vmul.f32 %v643_v36, %v643_v36  ;;  %v656_v55 = vsub.f32 %v3824_v52, %v643_v36  ;;  %v657_v57 = vsub.f32 %v3826_v56, %v643_v36 }
 0x280   :  { %v767_v29 = vrot.slane %v766_v27, 2  ;;  %v774_v30 = vadd.f32 %v773_v28, %v772_v25  ;;  %v2391_v28 = vld [vmem:[#allocation34 + $0x18] sm:$0xff] }
 0x281   :  { %v655_v42 = vsub.f32 %v653_v39, %v654_v40 }
 0x282   :  { %v768_v32 = vadd.f32 %v767_v29, %v766_v27  ;;  %v775_v33 = vrot.slane %v774_v30, 2  ;;  %v2373_v27 = vld [vmem:[#allocation35 + $0x8] sm:$0xff]  ;;  %v2407_v29 = vld [vmem:[#allocation41 + $0x18] sm:$0xff] }
 0x283   :  { %v658_v43 = vadd.f32 1e-05, %v655_v42 }
 0x284   :  { %v769_v34 = vrot.slane %v768_v32, 1  ;;  %v776_v36 = vadd.f32 %v775_v33, %v774_v30 }
 0x285   :  { %2516 = vrsqrt.f32 %v658_v43  ;;  %vm665_vm9 = vweird.f32 %v658_v43 }
 0x286   :  { %v770_v37 = vadd.f32 %v769_v34, %v768_v32  ;;  %v777_v38 = vrot.slane %v776_v36, 1 }
 0x288   :  { %v771_v39 = vmul.f32 %v770_v37, %v3813_v26  ;;  %v778_v40 = vadd.f32 %v777_v38, %v776_v36  ;;  %v2372_v36 = vld [vmem:[#allocation35] sm:$0xff]  ;;  %v2390_v37 = vld [vmem:[#allocation34 + $0x10] sm:$0xff] }
 0x289   :  { %v2406_v38 = vld [vmem:[#allocation41 + $0x10] sm:$0xff] }
 0x28a   :  { %v779_v41 = vmul.f32 %v778_v40, %v3813_v26  ;;  %v780_v42 = vmul.f32 %v771_v39, %v771_v39  ;;  %v782_v50 = vsub.f32 %v761_v23, %v771_v39  ;;  %v2408_v23 = vld [vmem:[#allocation41 + $0x20] sm:$0xff]  ;;  %v2387_v39 = vld [vmem:[#allocation32 + $0x38] sm:$0xff] }
 0x28b   :  { %v2517_v46 = vpop.eup %2516  ;;  %v2403_v40 = vld [vmem:[#allocation43 + $0x38] sm:$0xff] }
 0x28c   :  { %v660_v47 = vmul.f32 %v2517_v46, %v658_v43  ;;  %vm666_vm8 = vweird.f32 %v2517_v46  ;;  %v781_v43 = vsub.f32 %v779_v41, %v780_v42 }
 0x28d   :  { %vm667_vm10 = vmor %vm665_vm9, %vm666_vm8 }
 0x28e   :  { %v661_v48 = vmul.f32 %v2517_v46, %v660_v47  ;;  %v783_v44 = vadd.f32 1e-05, %v781_v43 }
 0x290   :  { %v662_v51 = vmul.f32 0.5, %v661_v48  ;;  %2518 = vrsqrt.f32 %v783_v44  ;;  %vm790_vm12 = vweird.f32 %v783_v44 }
 0x292   :  { %v663_v53 = vsub.f32 1.5, %v662_v51 }
 0x293   :  { %v960_v4 = vpop.f32.mrf.mxu3 }
 0x294   :  { %v664_v54 = vmul.f32 %v2517_v46, %v663_v53 }
 0x296   :  { %v668_v59 = vsel %vm667_vm10, %v2517_v46, %v664_v54  ;;  %v2519_v45 = vpop.eup %2518  ;;  %v2508_v54 = vld [vmem:[#allocation13] ss:$0 sm:$0xff] }
 0x297   :  { %v669_v60 = vmul.f32 %v668_v59, %v656_v55  ;;  %v670_v61 = vmul.f32 %v668_v59, %v657_v57  ;;  %v785_v46 = vmul.f32 %v2519_v45, %v783_v44  ;;  %vm791_vm13 = vweird.f32 %v2519_v45  ;;  %v2509_v57 = vld [vmem:[#allocation14] ss:$0 sm:$0xff]  ;;  %v2379_v59 = vld [vmem:[#allocation35 + $0x38] sm:$0xff] }
 0x298   :  { %vm792_vm14 = vmor %vm790_vm12, %vm791_vm13  ;;  %1424 = vmatpush.bf16.msrb.mxu1 %v2379_v59 }
 0x299   :  { %v674_v63 = vmul.f32 %v2491_v58, %v669_v60  ;;  %v675_v0 = vmul.f32 %v2491_v58, %v670_v61  ;;  %v2495_v60 = vld [vmem:[#allocation20] ss:$0 sm:$0xff] }
 0x29a   :  { %v2378_v61 = vld [vmem:[#allocation35 + $0x30] sm:$0xff] }
 0x29b   :  { %v679_v1 = vadd.f32 %v2492_v62, %v674_v63  ;;  %v680_v2 = vadd.f32 %v2492_v62, %v675_v0  ;;  %v962_v52 = vpop.f32.mrf.mxu3 }
 0x29c   :  { %1425 = vmatpush.bf16.msrb.mxu1 %v2378_v61  ;;  %v2376_v52 = vld [vmem:[#allocation35 + $0x20] sm:$0xff] }
 0x29d   :  { %v819_v3 = vpack.c.bf16 %v680_v2, %v679_v1  ;;  %v2377_v1 = vld [vmem:[#allocation35 + $0x28] sm:$0xff]  ;;  %v2395_v2 = vld [vmem:[#allocation34 + $0x38] sm:$0xff] }
 0x29f   :  { %880 = vmatmul.bf16.vlgmr.msra.gmra.mxu2 %v819_v3  ;;  %1036 = vmatmul.bf16.vlgmr.msra.gmra.mxu1 %v819_v3 }
 0x2a0   :  { %1426 = vmatpush.bf16.msrb.mxu1 %v2377_v1 }
 0x2a4   :  { %1427 = vmatpush.bf16.msrb.mxu1 %v2376_v52  ;;  %v2400_v52 = vld [vmem:[#allocation43 + $0x20] sm:$0xff] }
 0x2af   :  { %1282 = vmatmul.bf16.vlgmr.msrb.gmra.mxu2 %v819_v3  ;;  %v2411_v3 = vld [vmem:[#allocation41 + $0x38] sm:$0xff] }
 0x2b0   :  { %1817 = vmatpush.bf16.msra.mxu2 %v2411_v3 }
 0x31c   :  { %v1037_v6 = vpop.f32.mrf.mxu1 }
 0x322   :  { %v3851_v56 = vpop.f32.mrf.mxu2 }
 0x323   :  { %v882_v62 = vadd.f32 %v2495_v60, %v3851_v56 }
 0x324   :  { %v1039_v7 = vpop.f32.mrf.mxu1 }
 0x325   :  { %1064 = vmatpush.msrb.mxu0 %v1039_v7  ;;  %v2410_v7 = vld [vmem:[#allocation41 + $0x30] sm:$0xff] }
 0x326   :  { %1818 = vmatpush.bf16.msra.mxu2 %v2410_v7 }
 0x327   :  { %1065 = vmatpush.msrb.mxu0 %v1037_v6  ;;  %v2394_v6 = vld [vmem:[#allocation34 + $0x30] sm:$0xff] }
 0x329   :  { %1066 = vmatpush.msrb.mxu0 %v960_v4 }
 0x32a   :  { %v3856_v10 = vpop.f32.mrf.mxu2  ;;  %2102 = vmatmul.msk.f32.vlgmr.msrb.gmra.mxu0 %vm1044_vm11, %v3854_v8 }
 0x32b   :  { %1197 = vmatpush.bf16.msra.mxu0 %v2363_v9  ;;  %v884_v9 = vadd.f32 %v2495_v60, %v3856_v10 }
 0x32f   :  { %1198 = vmatpush.bf16.msra.mxu0 %v2362_v11 }
 0x332   :  { %2103 = vmatmul.msk.f32.gmra.mxu0 %vm1044_vm11, %v3861_v12  ;;  %v1283_v14 = vpop.f32.mrf.mxu2 }
 0x333   :  { %1199 = vmatpush.bf16.msra.mxu0 %v2361_v13 }
 0x337   :  { %1200 = vmatpush.bf16.msra.mxu0 %v2360_v15  ;;  %v2393_v15 = vld [vmem:[#allocation34 + $0x28] sm:$0xff] }
 0x33a   :  { %v1285_v17 = vpop.f32.mrf.mxu2 }
 0x33b   :  { %1201 = vmatpush.bf16.msra.mxu0 %v2359_v16  ;;  %1306 = vmatpush.msra.mxu3 %v1285_v17  ;;  %v2409_v16 = vld [vmem:[#allocation41 + $0x28] sm:$0xff] }
 0x33c   :  { %1819 = vmatpush.bf16.msra.mxu2 %v2409_v16  ;;  %v2382_v16 = vld [vmem:[#allocation32 + $0x10] sm:$0xff] }
 0x33d   :  { %1307 = vmatpush.msra.mxu3 %v1283_v14  ;;  %v2375_v14 = vld [vmem:[#allocation35 + $0x18] sm:$0xff] }
 0x33e   :  { %2168 = vmatmul.msk.f32.vlgmr.msra.gmra.mxu3 %vm597_vm0, %v3866_v19  ;;  %1428 = vmatpush.bf16.msrb.mxu1 %v2375_v14 }
 0x33f   :  { %1202 = vmatpush.bf16.msra.mxu0 %v2358_v18  ;;  %1503 = vmatpush.bf16.msrb.mxu3 %v2387_v39 }
 0x340   :  { %1820 = vmatpush.bf16.msra.mxu2 %v2408_v23  ;;  %v2381_v23 = vld [vmem:[#allocation32 + $0x8] sm:$0xff] }
 0x342   :  { %1429 = vmatpush.bf16.msrb.mxu1 %v2374_v21 }
 0x343   :  { %1203 = vmatpush.bf16.msra.mxu0 %v2357_v22  ;;  %v2392_v22 = vld [vmem:[#allocation34 + $0x20] sm:$0xff] }
 0x344   :  { %1821 = vmatpush.bf16.msra.mxu2 %v2407_v29 }
 0x346   :  { %1430 = vmatpush.bf16.msrb.mxu1 %v2373_v27 }
 0x347   :  { %1204 = vmatpush.bf16.msra.mxu0 %v2356_v24 }
 0x348   :  { %1822 = vmatpush.bf16.msra.mxu2 %v2406_v38 }
 0x34a   :  { %1205 = vmatmul.bf16.vlgmr.msra.gmra.mxu0 %v3842_v35  ;;  %v786_v35 = vmul.f32 %v2519_v45, %v785_v46  ;;  %1431 = vmatpush.bf16.msrb.mxu1 %v2372_v36  ;;  %v2405_v46 = vld [vmem:[#allocation41 + $0x8] sm:$0xff]  ;;  %v2396_v36 = vld [vmem:[#allocation43] sm:$0xff] }
 0x34b   :  { %1580 = vmatpush.bf16.msrb.mxu0 %v2395_v2 }
 0x34c   :  { %v787_v47 = vmul.f32 0.5, %v786_v35  ;;  %v2386_v35 = vld [vmem:[#allocation32 + $0x30] sm:$0xff]  ;;  %1823 = vmatpush.bf16.msra.mxu2 %v2405_v46 }
 0x34d   :  { %1504 = vmatpush.bf16.msrb.mxu3 %v2386_v35  ;;  %v2498_v46 = vld [vmem:[#allocation22] ss:$0 sm:$0xff] }
 0x34e   :  { %v788_v48 = vsub.f32 1.5, %v787_v47  ;;  %1740 = vmatpush.bf16.msra.mxu1 %v2403_v40  ;;  %v2402_v47 = vld [vmem:[#allocation43 + $0x30] sm:$0xff] }
 0x34f   :  { %1581 = vmatpush.bf16.msrb.mxu0 %v2394_v6 }
 0x350   :  { %v789_v49 = vmul.f32 %v2519_v45, %v788_v48 }
 0x352   :  { %v793_v51 = vsel %vm792_vm14, %v2519_v45, %v789_v49  ;;  %v2389_v45 = vld [vmem:[#allocation34 + $0x8] sm:$0xff]  ;;  %1741 = vmatpush.bf16.msra.mxu1 %v2402_v47 }
 0x353   :  { %v794_v53 = vmul.f32 %v793_v51, %v782_v50  ;;  %1582 = vmatpush.bf16.msrb.mxu0 %v2393_v15 }
 0x355   :  { %v798_v55 = vmul.f32 %v2508_v54, %v794_v53  ;;  %v2497_v53 = vld [vmem:[#allocation28] ss:$0 sm:$0xff]  ;;  %v2388_v54 = vld [vmem:[#allocation34] sm:$0xff] }
 0x357   :  { %v802_v58 = vadd.f32 %v2509_v57, %v798_v55  ;;  %1583 = vmatpush.bf16.msrb.mxu0 %v2392_v22  ;;  %v2404_v55 = vld [vmem:[#allocation41] sm:$0xff] }
 0x358   :  { %v2385_v57 = vld [vmem:[#allocation32 + $0x28] sm:$0xff]  ;;  %1824 = vmatpush.bf16.msra.mxu2 %v2404_v55 }
 0x359   :  { %1897 = vst [vmem:[#allocation52] sm:$0xff] %v802_v58  ;;  %v2401_v58 = vld [vmem:[#allocation43 + $0x28] sm:$0xff]  ;;  %1505 = vmatpush.bf16.msrb.mxu3 %v2385_v57 }
 0x35a   :  { %1742 = vmatpush.bf16.msra.mxu1 %v2401_v58 }
 0x35b   :  { %1584 = vmatpush.bf16.msrb.mxu0 %v2391_v28 }
 0x35e   :  { %1743 = vmatpush.bf16.msra.mxu1 %v2400_v52  ;;  %v2501_v52 = vld [vmem:[#allocation31] ss:$0 sm:$0xff] }
 0x35f   :  { %1585 = vmatpush.bf16.msrb.mxu0 %v2390_v37 }
 0x363   :  { %1586 = vmatpush.bf16.msrb.mxu0 %v2389_v45 }
 0x367   :  { %1587 = vmatpush.bf16.msrb.mxu0 %v2388_v54 }
 0x3a7   :  { %v1068_v63 = vpop.f32.mrf.mxu0 }
 0x3a8   :  { %v1074_v0 = vadd.f32 %v1068_v63, %v882_v62 }
 0x3aa   :  { %v1076_v4 = vmul.f32 0.5, %v1074_v0 }
 0x3ac   :  { %v1078_v56 = vmul.f32 0.01, %v1076_v4 }
 0x3ae   :  { %v3876_v18 = vmax.f32 %v1076_v4, %v1078_v56  ;;  %v2384_v4 = vld [vmem:[#allocation32 + $0x20] sm:$0xff] }
 0x3af   :  { %v1071_v11 = vpop.f32.mrf.mxu0  ;;  %1506 = vmatpush.bf16.msrb.mxu3 %v2384_v4 }
 0x3b0   :  { %v1075_v13 = vadd.f32 %v1071_v11, %v884_v9  ;;  %v1092_v24 = vmul.f32 %v3876_v18, %v3876_v18  ;;  %v2383_v9 = vld [vmem:[#allocation32 + $0x18] sm:$0xff] }
 0x3b2   :  { %v1077_v17 = vmul.f32 0.5, %v1075_v13  ;;  %v2399_v13 = vld [vmem:[#allocation43 + $0x18] sm:$0xff] }
 0x3b3   :  { %1507 = vmatpush.bf16.msrb.mxu3 %v2383_v9  ;;  %1744 = vmatpush.bf16.msra.mxu1 %v2399_v13 }
 0x3b4   :  { %v1079_v20 = vmul.f32 0.01, %v1077_v17 }
 0x3b6   :  { %v3878_v10 = vmax.f32 %v1077_v17, %v1079_v20  ;;  %v2398_v20 = vld [vmem:[#allocation43 + $0x10] sm:$0xff] }
 0x3b7   :  { %1508 = vmatpush.bf16.msrb.mxu3 %v2382_v16  ;;  %1745 = vmatpush.bf16.msra.mxu1 %v2398_v20 }
 0x3b8   :  { %v1084_v5 = vadd.f32 %v3878_v10, %v3876_v18  ;;  %v1093_v25 = vmul.f32 %v3878_v10, %v3878_v10 }
 0x3ba   :  { %v1085_v30 = vrot.slane %v1084_v5, 4  ;;  %v1094_v32 = vadd.f32 %v1093_v25, %v1092_v24  ;;  %v2397_v25 = vld [vmem:[#allocation43 + $0x8] sm:$0xff] }
 0x3bb   :  { %1509 = vmatpush.bf16.msrb.mxu3 %v2381_v23  ;;  %1746 = vmatpush.bf16.msra.mxu1 %v2397_v25 }
 0x3bc   :  { %v1086_v33 = vadd.f32 %v1085_v30, %v1084_v5  ;;  %v1095_v34 = vrot.slane %v1094_v32, 4 }
 0x3be   :  { %v1087_v41 = vrot.slane %v1086_v33, 2  ;;  %v1096_v42 = vadd.f32 %v1095_v34, %v1094_v32  ;;  %v2380_v32 = vld [vmem:[#allocation32] sm:$0xff] }
 0x3bf   :  { %1510 = vmatpush.bf16.msrb.mxu3 %v2380_v32  ;;  %1747 = vmatpush.bf16.msra.mxu1 %v2396_v36 }
 0x3c0   :  { %v1088_v43 = vadd.f32 %v1087_v41, %v1086_v33  ;;  %v1097_v44 = vrot.slane %v1096_v42, 2 }
 0x3c1   :  { %v1309_v62 = vpop.f32.mrf.mxu3 }
 0x3c2   :  { %v1089_v48 = vrot.slane %v1088_v43, 1  ;;  %v1098_v49 = vadd.f32 %v1097_v44, %v1096_v42 }
 0x3c4   :  { %v1090_v50 = vadd.f32 %v1089_v48, %v1088_v43  ;;  %v1099_v51 = vrot.slane %v1098_v49, 1 }
 0x3c6   :  { %v3887_v59 = vmul.f32 %v1090_v50, %v3840_v31  ;;  %v1100_v60 = vadd.f32 %v1099_v51, %v1098_v49  ;;  %v2499_v50 = vld [vmem:[#allocation23] ss:$0 sm:$0xff] }
 0x3c7   :  { %v1206_v61 = vpop.f32.mrf.mxu0 }
 0x3c8   :  { %v1101_v63 = vmul.f32 %v1100_v60, %v3840_v31  ;;  %v1102_v0 = vmul.f32 %v3887_v59, %v3887_v59  ;;  %v1105_v1 = vsub.f32 %v3878_v10, %v3887_v59  ;;  %v1207_v2 = vadd.f32 %v2497_v53, %v1206_v61 }
 0x3c9   :  { %v1104_v3 = vsub.f32 %v3876_v18, %v3887_v59 }
 0x3ca   :  { %v1103_v6 = vsub.f32 %v1101_v63, %v1102_v0  ;;  %v1312_v7 = vadd.f32 %v1309_v62, %v1207_v2  ;;  %v2500_v2 = vld [vmem:[#allocation29] ss:$0 sm:$0xff] }
 0x3cc   :  { %v1106_v11 = vadd.f32 1e-05, %v1103_v6  ;;  %v1313_v56 = vmul.f32 0.01, %v1312_v7 }
 0x3ce   :  { %2520 = vrsqrt.f32 %v1106_v11  ;;  %v3896_v14 = vmax.f32 %v1312_v7, %v1313_v56  ;;  %vm1113_vm1 = vweird.f32 %v1106_v11 }
 0x3cf   :  { %v1208_v15 = vpop.f32.mrf.mxu0 }
 0x3d0   :  { %v1317_v17 = vrot.slane %v3896_v14, 4  ;;  %v1324_v18 = vmul.f32 %v3896_v14, %v3896_v14 }
 0x3d2   :  { %v1318_v21 = vadd.f32 %v1317_v17, %v3896_v14  ;;  %v1325_v22 = vrot.slane %v1324_v18, 4 }
 0x3d4   :  { %v2521_v10 = vpop.eup %2520  ;;  %v1319_v24 = vrot.slane %v1318_v21, 2  ;;  %v1326_v5 = vadd.f32 %v1325_v22, %v1324_v18  ;;  %v2503_v22 = vld [vmem:[#allocation44] ss:$0 sm:$0xff] }
 0x3d5   :  { %v1108_v27 = vmul.f32 %v2521_v10, %v1106_v11  ;;  %vm1114_vm15 = vweird.f32 %v2521_v10 }
 0x3d6   :  { %v1320_v28 = vadd.f32 %v1319_v24, %v1318_v21  ;;  %v1327_v29 = vrot.slane %v1326_v5, 2  ;;  %vm1115_vm2 = vmor %vm1113_vm1, %vm1114_vm15 }
 0x3d7   :  { %v1109_v30 = vmul.f32 %v2521_v10, %v1108_v27 }
 0x3d8   :  { %v1321_v33 = vrot.slane %v1320_v28, 1  ;;  %v1328_v34 = vadd.f32 %v1327_v29, %v1326_v5 }
 0x3d9   :  { %v1110_v37 = vmul.f32 0.5, %v1109_v30 }
 0x3da   :  { %v1322_v38 = vadd.f32 %v1321_v33, %v1320_v28  ;;  %v1329_v39 = vrot.slane %v1328_v34, 1 }
 0x3db   :  { %v1111_v40 = vsub.f32 1.5, %v1110_v37 }
 0x3dc   :  { %v1323_v41 = vmul.f32 %v1322_v38, %v3813_v26  ;;  %v1330_v42 = vadd.f32 %v1329_v39, %v1328_v34 }
 0x3dd   :  { %v1112_v43 = vmul.f32 %v2521_v10, %v1111_v40 }
 0x3de   :  { %v1331_v44 = vmul.f32 %v1330_v42, %v3813_v26  ;;  %v1332_v45 = vmul.f32 %v1323_v41, %v1323_v41 }
 0x3df   :  { %v1116_v35 = vsel %vm1115_vm2, %v2521_v10, %v1112_v43  ;;  %v2502_v10 = vld [vmem:[#allocation37] ss:$0 sm:$0xff] }
 0x3e0   :  { %v1118_v47 = vmul.f32 %v1116_v35, %v1105_v1  ;;  %v1333_v48 = vsub.f32 %v1331_v44, %v1332_v45  ;;  %v1117_v49 = vmul.f32 %v1116_v35, %v1104_v3  ;;  %v1334_v1 = vsub.f32 %v3896_v14, %v1323_v41 }
 0x3e2   :  { %v1335_v51 = vadd.f32 1e-05, %v1333_v48  ;;  %v1122_v53 = vmul.f32 %v2498_v46, %v1117_v49  ;;  %v1123_v54 = vmul.f32 %v2498_v46, %v1118_v47 }
 0x3e4   :  { %2522 = vrsqrt.f32 %v1335_v51  ;;  %v1127_v55 = vadd.f32 %v2499_v50, %v1122_v53  ;;  %v1128_v57 = vadd.f32 %v2499_v50, %v1123_v54  ;;  %vm1342_vm4 = vweird.f32 %v1335_v51 }
 0x3e6   :  { %v1371_v58 = vpack.c.bf16 %v1128_v57, %v1127_v55 }
 0x3e8   :  { %1432 = vmatmul.bf16.vlgmr.msrb.gmra.mxu1 %v1371_v58  ;;  %1588 = vmatmul.bf16.vlgmr.msrb.gmra.mxu0 %v1371_v58 }
 0x3e9   :  { %1825 = vmatmul.bf16.vlgmr.msra.gmra.mxu2 %v1371_v58 }
 0x3ea   :  { %v2523_v59 = vpop.eup %2522 }
 0x3eb   :  { %v1337_v60 = vmul.f32 %v2523_v59, %v1335_v51  ;;  %vm1343_vm3 = vweird.f32 %v2523_v59 }
 0x3ec   :  { %vm1344_vm5 = vmor %vm1342_vm4, %vm1343_vm3 }
 0x3ed   :  { %v1338_v61 = vmul.f32 %v2523_v59, %v1337_v60 }
 0x3ef   :  { %v1339_v62 = vmul.f32 0.5, %v1338_v61 }
 0x3f1   :  { %v1340_v63 = vsub.f32 1.5, %v1339_v62 }
 0x3f3   :  { %v1341_v0 = vmul.f32 %v2523_v59, %v1340_v63 }
 0x3f5   :  { %v1345_v3 = vsel %vm1344_vm5, %v2523_v59, %v1341_v0 }
 0x3f6   :  { %v1346_v4 = vmul.f32 %v1345_v3, %v1334_v1 }
 0x3f8   :  { %v1350_v6 = vmul.f32 %v2500_v2, %v1346_v4 }
 0x3fa   :  { %v1354_v7 = vadd.f32 %v2501_v52, %v1350_v6 }
 0x3fc   :  { %v1454_v9 = vpack.c.bf16 %v1354_v7, %v1354_v7 }
 0x3fe   :  { %1511 = vmatmul.bf16.vlgmr.msrb.gmra.mxu3 %v1454_v9  ;;  %1748 = vmatmul.bf16.vlgmr.msra.gmra.mxu1 %v1454_v9 }
 0x465   :  { %v1589_v11 = vpop.f32.mrf.mxu0  ;;  %v1433_v56 = vpop.f32.mrf.mxu1 }
 0x466   :  { %v1434_v27 = vadd.f32 %v2502_v10, %v1433_v56 }
 0x46c   :  { %v1826_v13 = vpop.f32.mrf.mxu2 }
 0x46d   :  { %v1591_v15 = vpop.f32.mrf.mxu0  ;;  %v1435_v16 = vpop.f32.mrf.mxu1 }
 0x46e   :  { %1607 = vmatpush.msra.mxu0 %v1591_v15  ;;  %v1436_v37 = vadd.f32 %v2502_v10, %v1435_v16 }
 0x470   :  { %1608 = vmatpush.msra.mxu0 %v1589_v11 }
 0x474   :  { %v1828_v17 = vpop.f32.mrf.mxu2 }
 0x475   :  { %1845 = vmatpush.msra.mxu3 %v1828_v17 }
 0x477   :  { %1846 = vmatpush.msra.mxu3 %v1826_v13 }
 0x478   :  { %2331 = vmatmul.msk.f32.vlgmr.msra.gmra.mxu3 %vm597_vm0, %v3866_v19 }
 0x47b   :  { %v1749_v14 = vpop.f32.mrf.mxu1 }
 0x47c   :  { %v1750_v23 = vadd.f32 %v2503_v22, %v1749_v14 }
 0x481   :  { %v1512_v18 = vpop.f32.mrf.mxu3 }
 0x482   :  { %1609 = vmatpush.msra.mxu0 %v1512_v18 }
 0x483   :  { %2265 = vmatmul.msk.f32.vlgmr.msra.gmra.mxu0 %vm1044_vm11, %v3854_v8  ;;  %v1751_v20 = vpop.f32.mrf.mxu1 }
 0x489   :  { %v1514_v21 = vpop.f32.mrf.mxu3 }
 0x48b   :  { %2266 = vmatmul.msk.f32.gmra.mxu0 %vm1044_vm11, %v3861_v12 }
 0x4fb   :  { %v1848_v24 = vpop.f32.mrf.mxu3 }
 0x4fc   :  { %v1851_v5 = vadd.f32 %v1848_v24, %v1750_v23  ;;  %v2504_v24 = vld [vmem:[#allocation46] ss:$0 sm:$0xff] }
 0x4fe   :  { %v1852_v25 = vmul.f32 0.01, %v1851_v5 }
 0x500   :  { %v3911_v28 = vmax.f32 %v1851_v5, %v1852_v25  ;;  %v1611_v19 = vpop.f32.mrf.mxu0 }
 0x501   :  { %v1617_v29 = vadd.f32 %v1611_v19, %v1434_v27  ;;  %v2505_v27 = vld [vmem:[#allocation47] ss:$0 sm:$0xff] }
 0x502   :  { %v1856_v30 = vrot.slane %v3911_v28, 4  ;;  %v1863_v8 = vmul.f32 %v3911_v28, %v3911_v28 }
 0x503   :  { %v1619_v12 = vmul.f32 0.5, %v1617_v29 }
 0x504   :  { %v1857_v32 = vadd.f32 %v1856_v30, %v3911_v28  ;;  %v1864_v33 = vrot.slane %v1863_v8, 4 }
 0x505   :  { %v1621_v41 = vmul.f32 0.01, %v1619_v12 }
 0x506   :  { %v1858_v34 = vrot.slane %v1857_v32, 2  ;;  %v1865_v36 = vadd.f32 %v1864_v33, %v1863_v8 }
 0x507   :  { %v3917_v47 = vmax.f32 %v1619_v12, %v1621_v41 }
 0x508   :  { %v1859_v38 = vadd.f32 %v1858_v34, %v1857_v32  ;;  %v1866_v39 = vrot.slane %v1865_v36, 2  ;;  %v1614_v40 = vpop.f32.mrf.mxu0 }
 0x509   :  { %v1618_v42 = vadd.f32 %v1614_v40, %v1436_v37  ;;  %v1635_v55 = vmul.f32 %v3917_v47, %v3917_v47 }
 0x50a   :  { %v1860_v43 = vrot.slane %v1859_v38, 1  ;;  %v1867_v44 = vadd.f32 %v1866_v39, %v1865_v36 }
 0x50b   :  { %v1620_v45 = vmul.f32 0.5, %v1618_v42 }
 0x50c   :  { %v1861_v46 = vadd.f32 %v1860_v43, %v1859_v38  ;;  %v1868_v35 = vrot.slane %v1867_v44, 1 }
 0x50d   :  { %v1622_v48 = vmul.f32 0.01, %v1620_v45 }
 0x50e   :  { %v1862_v49 = vmul.f32 %v1861_v46, %v3813_v26  ;;  %v1869_v50 = vadd.f32 %v1868_v35, %v1867_v44 }
 0x50f   :  { %v3920_v51 = vmax.f32 %v1620_v45, %v1622_v48 }
 0x510   :  { %v1870_v53 = vmul.f32 %v1869_v50, %v3813_v26  ;;  %v1871_v54 = vmul.f32 %v1862_v49, %v1862_v49 }
 0x511   :  { %v1627_v57 = vadd.f32 %v3920_v51, %v3917_v47  ;;  %v1636_v58 = vmul.f32 %v3920_v51, %v3920_v51 }
 0x512   :  { %v1872_v59 = vsub.f32 %v1870_v53, %v1871_v54 }
 0x513   :  { %v1628_v60 = vrot.slane %v1627_v57, 4  ;;  %v1637_v61 = vadd.f32 %v1636_v58, %v1635_v55 }
 0x514   :  { %v1874_v62 = vadd.f32 1e-05, %v1872_v59 }
 0x515   :  { %v1629_v63 = vadd.f32 %v1628_v60, %v1627_v57  ;;  %v1638_v0 = vrot.slane %v1637_v61, 4 }
 0x516   :  { %2524 = vrsqrt.f32 %v1874_v62  ;;  %vm1881_vm6 = vweird.f32 %v1874_v62 }
 0x517   :  { %v1630_v1 = vrot.slane %v1629_v63, 2  ;;  %v1639_v2 = vadd.f32 %v1638_v0, %v1637_v61 }
 0x519   :  { %v1631_v26 = vadd.f32 %v1630_v1, %v1629_v63  ;;  %v1640_v3 = vrot.slane %v1639_v2, 2 }
 0x51b   :  { %v1632_v4 = vrot.slane %v1631_v26, 1  ;;  %v1641_v52 = vadd.f32 %v1640_v3, %v1639_v2 }
 0x51c   :  { %v2525_v6 = vpop.eup %2524 }
 0x51d   :  { %v1633_v7 = vadd.f32 %v1632_v4, %v1631_v26  ;;  %v1642_v9 = vrot.slane %v1641_v52, 1  ;;  %v1876_v11 = vmul.f32 %v2525_v6, %v1874_v62  ;;  %vm1882_vm0 = vweird.f32 %v2525_v6 }
 0x51e   :  { %vm1883_vm7 = vmor %vm1881_vm6, %vm1882_vm0 }
 0x51f   :  { %v3930_v56 = vmul.f32 %v1633_v7, %v3840_v31  ;;  %v1643_v13 = vadd.f32 %v1642_v9, %v1641_v52  ;;  %v1877_v15 = vmul.f32 %v2525_v6, %v1876_v11 }
 0x521   :  { %v1644_v16 = vmul.f32 %v1643_v13, %v3840_v31  ;;  %v1645_v17 = vmul.f32 %v3930_v56, %v3930_v56  ;;  %v1647_v14 = vsub.f32 %v3917_v47, %v3930_v56  ;;  %v1648_v18 = vsub.f32 %v3920_v51, %v3930_v56 }
 0x522   :  { %v1878_v20 = vmul.f32 0.5, %v1877_v15  ;;  %v1873_v31 = vsub.f32 %v3911_v28, %v1862_v49 }
 0x523   :  { %v1646_v21 = vsub.f32 %v1644_v16, %v1645_v17 }
 0x524   :  { %v1879_v22 = vsub.f32 1.5, %v1878_v20 }
 0x525   :  { %v1649_v23 = vadd.f32 1e-05, %v1646_v21 }
 0x526   :  { %v1880_v10 = vmul.f32 %v2525_v6, %v1879_v22 }
 0x527   :  { %2526 = vrsqrt.f32 %v1649_v23 }
 0x528   :  { %v1884_v5 = vsel %vm1883_vm7, %v2525_v6, %v1880_v10 }
 0x529   :  { %v1885_v25 = vmul.f32 %v1884_v5, %v1873_v31 }
 0x52b   :  { %v1889_v19 = vmul.f32 %v2504_v24, %v1885_v25 }
 0x52d   :  { %v2527_v29 = vpop.eup %2526  ;;  %v1893_v30 = vadd.f32 %v2505_v27, %v1889_v19 }
 0x52e   :  { %v1651_v28 = vmul.f32 %v2527_v29, %v1649_v23 }
 0x52f   :  { %1896 = vst [vmem:[#allocation50] sm:$0xff] %v1893_v30 }
 0x530   :  { %v1652_v8 = vmul.f32 %v2527_v29, %v1651_v28 }
 0x531   :  { %3271 = shalt.err (!%p3268_p0)
}
 0x532   :  { %1921 = dma.vmem_to_hbm [thread:$0]  %s1917_s11, 128, %s1919_s15, [#allocation51]  }
 0x533   :  { %s3284_s23 = sshra.s32 %s1930_s12, 4  ;;  %s3288_s28 = scalar_lea.hbm %s3637_s25, 8  ;;  %s3285_s23 = int_to_ptr.hbm [resolvable:$true] %s3284_s23 }
 0x534   :  { %s3286_s4 = scalar_lea.hbm %s3285_s23, 8  ;;  %p3289_p2 = scmp.lt.s32.totalorder %s3285_s23, %s3637_s25 }
 0x535   :  { %p3287_p1 = scmp.ne.s32.totalorder %s3285_s23, %s3286_s4  ;;  %p3290_p3 = scmp.lt.s32.totalorder %s3288_s28, %s3286_s4 }
 0x537   :  { %p3291_p4 = por %p3290_p3, %p3289_p2 }
 0x539   :  { %p3292_p5 = pnand %p3291_p4, %p3287_p1 }
 0x53b   :  { %3295 = shalt.err (!%p3292_p5)
}
 0x53c   :  { %1932 = dma.vmem_to_hbm [thread:$0]  %s1928_s16, 128, %s1930_s12, [#allocation51]   ;;  %v1653_v32 = vmul.f32 0.5, %v1652_v8  ;;  %vm1657_vm8 = vweird.f32 %v2527_v29  ;;  %vm1656_vm9 = vweird.f32 %v1649_v23  ;;  %v2506_v34 = vld [vmem:[#allocation38] ss:$0 sm:$0xff] }
 0x53d   :  { %vm1658_vm10 = vmor %vm1656_vm9, %vm1657_vm8  ;;  %v2507_v39 = vld [vmem:[#allocation40] ss:$0 sm:$0xff]  ;;  %s3433_s9 = smov [#allocation49]   ;;  %s1904_s1 = sshll.u32 %s3627_s8, 4  ;;  %s1905_s1 = int_to_ptr.hbm [resolvable:$true] %s1904_s1 }
 0x53e   :  { %v1654_v33 = vsub.f32 1.5, %v1653_v32  ;;  %s1902_s25 = sshll.u32 %s3433_s9, 4  ;;  %s3308_s27 = sshra.s32 %s1905_s1, 4  ;;  %s1903_s25 = int_to_ptr.vmem [resolvable:$true] %s1902_s25  ;;  %s3309_s27 = int_to_ptr.hbm [resolvable:$true] %s3308_s27 }
 0x53f   :  { %s3310_s14 = scalar_lea.hbm %s3309_s27, 16  ;;  %s3312_s13 = scalar_lea.hbm %s3627_s8, 16 }
 0x540   :  { %v1655_v12 = vmul.f32 %v2527_v29, %v1654_v33  ;;  %p3311_p6 = scmp.ne.s32.totalorder %s3309_s27, %s3310_s14  ;;  %p3313_p7 = scmp.lt.s32.totalorder %s3309_s27, %s3627_s8 }
 0x541   :  { %p3314_p8 = scmp.lt.s32.totalorder %s3312_s13, %s3310_s14 }
 0x542   :  { %v1659_v36 = vsel %vm1658_vm10, %v2527_v29, %v1655_v12 }
 0x543   :  { %v1660_v37 = vmul.f32 %v1659_v36, %v1647_v14  ;;  %v1661_v38 = vmul.f32 %v1659_v36, %v1648_v18  ;;  %p3315_p9 = por %p3314_p8, %p3313_p7 }
 0x545   :  { %v1665_v40 = vmul.f32 %v2506_v34, %v1660_v37  ;;  %v1666_v41 = vmul.f32 %v2506_v34, %v1661_v38  ;;  %p3316_p10 = pnand %p3315_p9, %p3311_p6 }
 0x547   :  { %v1670_v42 = vadd.f32 %v2507_v39, %v1665_v40  ;;  %v1671_v43 = vadd.f32 %v2507_v39, %v1666_v41 }
 0x549   :  { %1894 = vst [vmem:[#allocation49] sm:$0xff] %v1670_v42 }
 0x54a   :  { %1895 = vst [vmem:[#allocation49 + $0x8] sm:$0xff] %v1671_v43 }
 0x54b   :  { %3319 = shalt.err (!%p3316_p10)
}
 0x54c   :  { %1910 = dma.vmem_to_hbm [thread:$0]  %s1903_s25, 256, %s1905_s1, [#allocation4], %s3412_s29, %s3412_s29, %s3413_s6  }
 0x54d   :  { %3352 = dma.done.wait [#allocation4], 256  }
 0x54e   :  { %3353 = vsyncadd [#allocation4], 4294967040 }
 0x54f   :  { %3354 = dma.done.wait [#allocation51], 256  }
 0x550   :  { %3355 = vsyncadd [#allocation51], 4294967040 }
 0x551   :  { %1945 = vsyncpa [#allocation3], 1 }
 0x552   :  { %1946 = vsyncpa [#allocation6], 1 }
 0x553   :  { %1947 = vsyncpa [#allocation9], 1 }
 0x554   :  { %1948 = vsyncpa [#allocation12], 1 }
 0x555   :  { %1949 = vsyncpa [#allocation15], 1 }
 0x556   :  { %1950 = vsyncpa [#allocation18], 1 }
 0x557   :  { %1951 = vsyncpa [#allocation21], 1 }
 0x558   :  { %1952 = vsyncpa [#allocation24], 1 }
 0x559   :  { %1953 = vsyncpa [#allocation27], 1 }
 0x55a   :  { %1954 = vsyncpa [#allocation30], 1 }
 0x55b   :  { %1955 = vsyncpa [#allocation33], 1 }
 0x55c   :  { %1956 = vsyncpa [#allocation36], 1 }
 0x55d   :  { %1957 = vsyncpa [#allocation39], 1 }
 0x55e   :  { %1958 = vsyncpa [#allocation42], 1 }
 0x55f   :  { %1959 = vsyncpa [#allocation45], 1 }
 0x560   :  { %1960 = vsyncpa [#allocation48], 1 }
 0x561   :  { %1961 = vsyncpa [#allocation4], 1 }
 0x562   :  { %1962 = vsyncpa [#allocation51], 1 }

</bundles_post_ra>
